<compile_context>
chip_gen: v7x
topology: tpu7x:2x2x1
jax: 0.10.0
libtpu: 0.0.40
codegen_flags: <defaults>
</compile_context>

<pallas_src>
import math

import jax
import jax.numpy as jnp
from jax.experimental import pallas as pl
from jax.experimental.pallas import tpu as pltpu


# ----------------------------------------------------------------------------
# constants / helpers
# ----------------------------------------------------------------------------
_LN_EPS = 1e-5
_GELU_C = math.sqrt(2.0 / math.pi)
_NEG_INF = -1e9
_FFN_CHUNK = 512          # F-axis chunk size (multiple of 128 at real model sizes)

_VMEM_LIMIT_CACHE = [None]


def _compiler_params():
    """Scoped VMEM limit derived from the chip: ~48 MiB on v7x (64 MiB/TC), ~100 MiB on v5e/v6e."""
    if _VMEM_LIMIT_CACHE[0] is None:
        try:
            cap = pltpu.get_tpu_info().vmem_capacity_bytes
        except Exception:                              # conservative fallback
            cap = 64 * 1024 * 1024
        _VMEM_LIMIT_CACHE[0] = max(32 * 1024 * 1024,
                                   min(cap - 16 * 1024 * 1024, 100 * 1024 * 1024))
    return pltpu.CompilerParams(
        dimension_semantics=("parallel",),             # batch rows are independent (megacore)
        vmem_limit_bytes=_VMEM_LIMIT_CACHE[0],
    )


def _layer_norm(v, g, b):
    mu = jnp.mean(v, axis=-1, keepdims=True)
    var = jnp.mean(jnp.square(v - mu), axis=-1, keepdims=True)
    return (v - mu) * jax.lax.rsqrt(var + _LN_EPS) * g + b


def _softmax_lastdim(s):
    m = jnp.max(s, axis=-1, keepdims=True)
    p = jnp.exp(s - m)
    return p * pl.reciprocal(jnp.sum(p, axis=-1, keepdims=True), approx=True)


def _gelu(v):                                          # tanh-approx GELU (EUP tanh path)
    return 0.5 * v * (1.0 + jnp.tanh(_GELU_C * (v + 0.044715 * v * v * v)))


def _bspec(*trail):
    """BlockSpec selecting one batch row (leading dim squeezed), 1-D batch grid."""
    nd = len(trail)
    return pl.BlockSpec((None,) + tuple(trail), lambda b: (b,) + (0,) * nd)


def _wspec():
    """Whole-array, single-buffered VMEM-resident parameter (no pipeline double-buffering)."""
    return pl.BlockSpec(memory_space=pltpu.MemorySpace.VMEM)


# ----------------------------------------------------------------------------
# Pallas kernels
# ----------------------------------------------------------------------------
def layer_kernel(x_ref, mask_ref, ln1_g, ln1_b, wqkv3, bqkv3, wo, bo,
                 ln2_g, ln2_b, w1, b1, w2, b2, o_ref):
    """One full transformer layer for one batch row, fully resident in VMEM."""
    x = x_ref[...]                                               # (S, H) f32
    S, H = x.shape
    heads = wqkv3.shape[0]
    dh = wqkv3.shape[2] // 3

    # ---- attention sub-layer (pre-norm); 1/sqrt(dh) is pre-folded into the Q weights ----
    h16 = _layer_norm(x, ln1_g[...], ln1_b[...]).astype(jnp.bfloat16)        # (S, H)
    h3 = jnp.broadcast_to(h16, (heads, S, H))                                # hoisted once
    qkv = jnp.einsum("hsd,hdf->hsf", h3, wqkv3[...],
                     preferred_element_type=jnp.float32)                     # (heads, S, 3dh)
    qkv = (qkv + bqkv3[...]).astype(jnp.bfloat16)                            # single bf16 cast
    q = qkv[..., :dh]
    k = qkv[..., dh:2 * dh]
    v = qkv[..., 2 * dh:]

    # additive key-padding bias; (1, S) broadcasts over heads and query rows
    mask = mask_ref[...]                                                     # (1, S) f32
    bias = jnp.where(mask > 0, jnp.zeros_like(mask), jnp.full_like(mask, _NEG_INF))

    s = jnp.einsum("hqd,hkd->hqk", q, k, preferred_element_type=jnp.float32)  # (heads, S, S)
    p = _softmax_lastdim(s + bias)
    ctx = jnp.einsum("hqk,hkd->hqd", p.astype(jnp.bfloat16), v,
                     preferred_element_type=jnp.float32)                     # (heads, S, dh)

    # re-interleave heads along the lane axis -> single K=H output projection
    ctx2d = jnp.concatenate([ctx[h] for h in range(heads)],
                            axis=-1).astype(jnp.bfloat16)                    # (S, H) bf16
    attn = jnp.dot(ctx2d, wo[...], preferred_element_type=jnp.float32)       # (S, H)
    x = x + attn + bo[...]

    # ---- feed-forward sub-layer (pre-norm, tanh-GELU), chunked along F ------------------
    # TODO(synk): on v7x at very large F, stream w1/w2 chunks from HBM (pl.ANY + async copy)
    #             instead of keeping them fully VMEM-resident.
    h2 = _layer_norm(x, ln2_g[...], ln2_b[...]).astype(jnp.bfloat16)
    F = w1.shape[1]
    f_chunk = F if (F <= _FFN_CHUNK or F % _FFN_CHUNK != 0) else _FFN_CHUNK
    n_chunks = F // f_chunk

    if n_chunks == 1:
        ff = jnp.dot(h2, w1[...], preferred_element_type=jnp.float32) + b1[...]
        ffo = jnp.dot(_gelu(ff).astype(jnp.bfloat16), w2[...],
                      preferred_element_type=jnp.float32)
    else:
        def body(c, acc):
            off = pl.multiple_of(c * f_chunk, f_chunk)
            ffc = jnp.dot(h2, w1[:, pl.ds(off, f_chunk)],
                          preferred_element_type=jnp.float32) + b1[:, pl.ds(off, f_chunk)]
            ffc = _gelu(ffc).astype(jnp.bfloat16)
            return acc + jnp.dot(ffc, w2[pl.ds(off, f_chunk), :],
                                 preferred_element_type=jnp.float32)
        ffo = jax.lax.fori_loop(0, n_chunks, body,
                                jnp.zeros((S, H), jnp.float32), unroll=True)

    o_ref[...] = x + ffo + b2[...]


def nsp_kernel(x_ref, mask_ref, n1g, n1b, wcw, bcw, n2g, n2b, w1, b1, w2, b2, o_ref):
    """NextSentencePrediction head, fused; one batch row per grid step."""
    x = x_ref[...]                                               # (S, H) f32
    mask_pad = mask_ref[...]                                     # (S, 1), 1.0 valid / 0.0 pad
    # lane-dense logits: row-wise dot with the (1, H) weight row instead of an (H,1) matmul
    h = _layer_norm(x, n1g[...], n1b[...])
    aw = jnp.sum(h * wcw[...], axis=-1, keepdims=True) + bcw[...]            # (S, 1)
    aw = jnp.where(mask_pad == 0, jnp.full_like(aw, _NEG_INF), aw)           # masked_fill
    m = jnp.max(aw, axis=0, keepdims=True)                                   # softmax over seq
    p = jnp.exp(aw - m)
    attn = p * pl.reciprocal(jnp.sum(p, axis=0, keepdims=True), approx=True)
    pooled = jnp.sum(attn * x, axis=0, keepdims=True)                        # (1, H)
    h2 = _layer_norm(pooled, n2g[...], n2b[...]).astype(jnp.bfloat16)
    h2 = jnp.maximum(jnp.dot(h2, w1[...], preferred_element_type=jnp.float32) + b1[...], 0.0)
    out = jnp.dot(h2.astype(jnp.bfloat16), w2[...],
                  preferred_element_type=jnp.float32) + b2[...]              # (1, out_dim)
    o_ref[...] = out


# ----------------------------------------------------------------------------
# wrappers
# ----------------------------------------------------------------------------
def transformer_block(x, key_mask, p):
    N, S, H = x.shape
    # TODO(synk): for v7x with small/odd N, block several batch rows (or add a parallel
    #             S-tile axis) per grid step so both TensorCores stay busy.
    return pl.pallas_call(
        layer_kernel,
        out_shape=jax.ShapeDtypeStruct((N, S, H), jnp.float32),
        grid=(N,),
        in_specs=[_bspec(S, H), _bspec(1, S)] + [_wspec() for _ in range(12)],
        out_specs=_bspec(S, H),
        input_output_aliases={0: 0},                   # update x in place across layers
        compiler_params=_compiler_params(),
    )(x, key_mask, p["ln1_g"], p["ln1_b"], p["wqkv3"], p["bqkv3"], p["wo"], p["bo"],
      p["ln2_g"], p["ln2_b"], p["w1"], p["b1"], p["w2"], p["b2"])


def nsp_head(x, mask_pad, p):
    N, S, H = x.shape
    out_dim = p["w2"].shape[1]
    out = pl.pallas_call(
        nsp_kernel,
        out_shape=jax.ShapeDtypeStruct((N, 1, out_dim), jnp.float32),
        grid=(N,),
        in_specs=[_bspec(S, H), _bspec(S, 1)] + [_wspec() for _ in range(10)],
        out_specs=_bspec(1, out_dim),
        compiler_params=_compiler_params(),
    )(x, mask_pad, p["n1_g"], p["n1_b"], p["w_cw"], p["b_cw"],
      p["n2_g"], p["n2_b"], p["w1"], p["b1"], p["w2"], p["b2"])
    if out_dim == 1:                                   # regression: (N,1).squeeze() -> (N,)
        return out.reshape(N)
    return jax.nn.log_softmax(out.reshape(N, out_dim), axis=-1)


def ft_prot_eng_forward(params, tokens, segment_label=None):
    N, S = tokens.shape
    valid = (tokens > 0).astype(jnp.float32)
    mask_pad = valid[:, :, None]                       # (N, S, 1)  NSP head mask
    key_mask = valid[:, None, :]                       # (N, 1, S)  padding-key mask

    x = params["tok_emb"][tokens]                      # embedding gather (XLA glue)
    if params["abs_position_embed"]:
        x = x + params["pos_emb"][None, :S, :]
    if segment_label is not None:
        x = x + params["seg_emb"][segment_label]

    for layer in params["layers"]:
        x = transformer_block(x, key_mask, layer)

    return nsp_head(x, mask_pad, params["nsp"])


# ----------------------------------------------------------------------------
# deterministic parameter init (head-major fused QKV, bf16 weight storage)
# ----------------------------------------------------------------------------
def _sinusoidal_pe(max_len, H):
    pos = jnp.arange(max_len, dtype=jnp.float32)[:, None]
    div = jnp.exp(jnp.arange(0, H, 2, dtype=jnp.float32) * (-math.log(10000.0) / H))
    pe = jnp.zeros((max_len, H), jnp.float32)
    pe = pe.at[:, 0::2].set(jnp.sin(pos * div))
    pe = pe.at[:, 1::2].set(jnp.cos(pos * div))
    return pe


def init_params(key, vocab_size, hidden=32, n_layers=1, attn_heads=8,
                max_len=64, regression=True, abs_position_embed=True):
    assert hidden % attn_heads == 0
    F = hidden * 4
    dh = hidden // attn_heads
    scale = 1.0 / math.sqrt(dh)
    out_dim = 1 if regression else 2
    keys = iter(jax.random.split(key, 128))

    def dense(i, o):
        return 0.02 * jax.random.normal(next(keys), (i, o), jnp.float32)

    def head_major(w):                                  # (H, H) -> (heads, H, dh)
        return w.reshape(hidden, attn_heads, dh).transpose(1, 0, 2)

    def layer():
        wq, wk, wv = dense(hidden, hidden), dense(hidden, hidden), dense(hidden, hidden)
        wo = dense(hidden, hidden)
        # fused, head-major QKV weight; 1/sqrt(dh) folded into the Q block (and its bias).
        wqkv3 = jnp.concatenate([head_major(wq) * scale, head_major(wk), head_major(wv)],
                                axis=-1).astype(jnp.bfloat16)       # (heads, H, 3*dh)
        bqkv3 = jnp.zeros((attn_heads, 1, 3 * dh), jnp.float32)      # q-third pre-scaled (zero here)
        return dict(
            ln1_g=jnp.ones((1, hidden), jnp.float32), ln1_b=jnp.zeros((1, hidden), jnp.float32),
            wqkv3=wqkv3, bqkv3=bqkv3,
            wo=wo.astype(jnp.bfloat16), bo=jnp.zeros((1, hidden), jnp.float32),
            ln2_g=jnp.ones((1, hidden), jnp.float32), ln2_b=jnp.zeros((1, hidden), jnp.float32),
            w1=dense(hidden, F).astype(jnp.bfloat16), b1=jnp.zeros((1, F), jnp.float32),
            w2=dense(F, hidden).astype(jnp.bfloat16), b2=jnp.zeros((1, hidden), jnp.float32),
        )

    tok_emb = 0.02 * jax.random.normal(next(keys), (vocab_size, hidden), jnp.float32)
    tok_emb = tok_emb.at[0].set(0.0)                   # padding_idx = 0

    nsp = dict(
        n1_g=jnp.ones((1, hidden), jnp.float32), n1_b=jnp.zeros((1, hidden), jnp.float32),
        w_cw=0.02 * jax.random.normal(next(keys), (1, hidden), jnp.float32),   # Linear(H,1) row
        b_cw=jnp.zeros((1, 1), jnp.float32),
        n2_g=jnp.ones((1, hidden), jnp.float32), n2_b=jnp.zeros((1, hidden), jnp.float32),
        w1=dense(hidden, hidden).astype(jnp.bfloat16), b1=jnp.zeros((1, hidden), jnp.float32),
        w2=dense(hidden, out_dim).astype(jnp.bfloat16), b2=jnp.zeros((1, out_dim), jnp.float32),
    )

    return dict(
        hidden=hidden, attn_heads=attn_heads, abs_position_embed=abs_position_embed,
        tok_emb=tok_emb, pos_emb=_sinusoidal_pe(max_len, hidden),
        seg_emb=0.02 * jax.random.normal(next(keys), (3, hidden), jnp.float32),
        layers=[layer() for _ in range(n_layers)],
        nsp=nsp,
    )


# ----------------------------------------------------------------------------
if __name__ == "__main__":
    key = jax.random.PRNGKey(0)
    pkey, tkey = jax.random.split(key)

    vocab_size, N, S, H = 24, 2, 8, 32
    params = init_params(pkey, vocab_size, hidden=H, n_layers=1, attn_heads=8)

    tokens = jax.random.randint(tkey, (N, S), 1, vocab_size, dtype=jnp.int32)
    tokens = tokens.at[1, -2:].set(0)          # padding tail on the second sequence

    out = ft_prot_eng_forward(params, tokens)  # regression=True -> shape (N,)
    out = jax.block_until_ready(out)
    assert out.shape == (N,), out.shape
    print("KERNEL_OK")
</pallas_src>

<mosaic_0001>
module attributes {stable_mosaic.version = 11 : i64} {
  func.func @layer_kernel(%arg0: i32, %arg1: memref<1x8x32xf32, #tpu.memory_space<vmem>>, %arg2: memref<1x1x8xf32, #tpu.memory_space<vmem>>, %arg3: memref<1x32xf32, #tpu.memory_space<vmem>>, %arg4: memref<1x32xf32, #tpu.memory_space<vmem>>, %arg5: memref<8x32x12xbf16, #tpu.memory_space<vmem>>, %arg6: memref<8x1x12xf32, #tpu.memory_space<vmem>>, %arg7: memref<32x32xbf16, #tpu.memory_space<vmem>>, %arg8: memref<1x32xf32, #tpu.memory_space<vmem>>, %arg9: memref<1x32xf32, #tpu.memory_space<vmem>>, %arg10: memref<1x32xf32, #tpu.memory_space<vmem>>, %arg11: memref<32x128xbf16, #tpu.memory_space<vmem>>, %arg12: memref<1x128xf32, #tpu.memory_space<vmem>>, %arg13: memref<128x32xbf16, #tpu.memory_space<vmem>>, %arg14: memref<1x32xf32, #tpu.memory_space<vmem>>, %arg15: memref<1x8x32xf32, #tpu.memory_space<vmem>>) attributes {dimension_semantics = [#tpu.dimension_semantics<parallel>], iteration_bounds = array<i64: 2>, scalar_prefetch = 0 : i64, scratch_operands = 0 : i64, tpu.core_type = #tpu.core_type<tc>, window_params = [{transform_indices = @transform_0, window_bounds = array<i64: 1, 8, 32>}, {transform_indices = @transform_1, window_bounds = array<i64: 1, 1, 8>}, {pipeline_mode = #tpu.pipeline_mode<synchronous>, transform_indices = @transform_2, window_bounds = array<i64: 1, 32>}, {pipeline_mode = #tpu.pipeline_mode<synchronous>, transform_indices = @transform_3, window_bounds = array<i64: 1, 32>}, {pipeline_mode = #tpu.pipeline_mode<synchronous>, transform_indices = @transform_4, window_bounds = array<i64: 8, 32, 12>}, {pipeline_mode = #tpu.pipeline_mode<synchronous>, transform_indices = @transform_5, window_bounds = array<i64: 8, 1, 12>}, {pipeline_mode = #tpu.pipeline_mode<synchronous>, transform_indices = @transform_6, window_bounds = array<i64: 32, 32>}, {pipeline_mode = #tpu.pipeline_mode<synchronous>, transform_indices = @transform_7, window_bounds = array<i64: 1, 32>}, {pipeline_mode = #tpu.pipeline_mode<synchronous>, transform_indices = @transform_8, window_bounds = array<i64: 1, 32>}, {pipeline_mode = #tpu.pipeline_mode<synchronous>, transform_indices = @transform_9, window_bounds = array<i64: 1, 32>}, {pipeline_mode = #tpu.pipeline_mode<synchronous>, transform_indices = @transform_10, window_bounds = array<i64: 32, 128>}, {pipeline_mode = #tpu.pipeline_mode<synchronous>, transform_indices = @transform_11, window_bounds = array<i64: 1, 128>}, {pipeline_mode = #tpu.pipeline_mode<synchronous>, transform_indices = @transform_12, window_bounds = array<i64: 128, 32>}, {pipeline_mode = #tpu.pipeline_mode<synchronous>, transform_indices = @transform_13, window_bounds = array<i64: 1, 32>}, {transform_indices = @transform_14, window_bounds = array<i64: 1, 8, 32>}]} {
    %c0 = arith.constant 0 : index
    %c0_0 = arith.constant 0 : index
    %c0_1 = arith.constant 0 : index
    %0 = vector.load %arg1[%c0, %c0_0, %c0_1] : memref<1x8x32xf32, #tpu.memory_space<vmem>>, vector<1x8x32xf32>
    %1 = vector.shape_cast %0 : vector<1x8x32xf32> to vector<8x32xf32>
    %c0_2 = arith.constant 0 : index
    %c0_3 = arith.constant 0 : index
    %2 = vector.load %arg3[%c0_2, %c0_3] : memref<1x32xf32, #tpu.memory_space<vmem>>, vector<1x32xf32>
    %c0_4 = arith.constant 0 : index
    %c0_5 = arith.constant 0 : index
    %3 = vector.load %arg4[%c0_4, %c0_5] : memref<1x32xf32, #tpu.memory_space<vmem>>, vector<1x32xf32>
    %cst = arith.constant dense<0.000000e+00> : vector<8xf32>
    %4 = vector.multi_reduction <add>, %1, %cst [1] : vector<8x32xf32> to vector<8xf32>
    %5 = vector.shape_cast %4 : vector<8xf32> to vector<8x1xf32>
    %cst_6 = arith.constant 3.200000e+01 : f32
    %6 = vector.broadcast %cst_6 : f32 to vector<8x1xf32>
    %7 = arith.divf %5, %6 : vector<8x1xf32>
    %8 = vector.broadcast %7 : vector<8x1xf32> to vector<8x32xf32>
    %9 = arith.subf %1, %8 : vector<8x32xf32>
    %10 = arith.mulf %9, %9 : vector<8x32xf32>
    %cst_7 = arith.constant dense<0.000000e+00> : vector<8xf32>
    %11 = vector.multi_reduction <add>, %10, %cst_7 [1] : vector<8x32xf32> to vector<8xf32>
    %12 = vector.shape_cast %11 : vector<8xf32> to vector<8x1xf32>
    %cst_8 = arith.constant 3.200000e+01 : f32
    %13 = vector.broadcast %cst_8 : f32 to vector<8x1xf32>
    %14 = arith.divf %12, %13 : vector<8x1xf32>
    %15 = vector.broadcast %7 : vector<8x1xf32> to vector<8x32xf32>
    %16 = arith.subf %1, %15 : vector<8x32xf32>
    %cst_9 = arith.constant 9.99999974E-6 : f32
    %17 = vector.broadcast %cst_9 : f32 to vector<8x1xf32>
    %18 = arith.addf %14, %17 : vector<8x1xf32>
    %19 = math.rsqrt %18 : vector<8x1xf32>
    %20 = vector.broadcast %19 : vector<8x1xf32> to vector<8x32xf32>
    %21 = arith.mulf %16, %20 : vector<8x32xf32>
    %22 = vector.broadcast %2 : vector<1x32xf32> to vector<8x32xf32>
    %23 = arith.mulf %21, %22 : vector<8x32xf32>
    %24 = vector.broadcast %3 : vector<1x32xf32> to vector<8x32xf32>
    %25 = arith.addf %23, %24 : vector<8x32xf32>
    %26 = arith.truncf %25 : vector<8x32xf32> to vector<8x32xbf16>
    %27 = vector.shape_cast %26 : vector<8x32xbf16> to vector<1x8x32xbf16>
    %28 = vector.broadcast %27 : vector<1x8x32xbf16> to vector<8x8x32xbf16>
    %c0_10 = arith.constant 0 : index
    %c0_11 = arith.constant 0 : index
    %c0_12 = arith.constant 0 : index
    %29 = vector.load %arg5[%c0_10, %c0_11, %c0_12] : memref<8x32x12xbf16, #tpu.memory_space<vmem>>, vector<8x32x12xbf16>
    "tpu.trace_start"() <{level = 10 : i32, message = "hsd,hdf->hsf"}> : () -> ()
    %cst_13 = arith.constant dense<0.000000e+00> : vector<8x8x12xf32>
    %30 = tpu.matmul %28, %29, %cst_13 {dimension_numbers = #tpu.dot_dimension_numbers<[2], [1], [1], [2], [0, 0, 0, 1, 1, 2], [0], [0]>} : vector<8x8x32xbf16>, vector<8x32x12xbf16>, vector<8x8x12xf32> -> vector<8x8x12xf32>
    "tpu.trace_stop"() : () -> ()
    %c0_14 = arith.constant 0 : index
    %c0_15 = arith.constant 0 : index
    %c0_16 = arith.constant 0 : index
    %31 = vector.load %arg6[%c0_14, %c0_15, %c0_16] : memref<8x1x12xf32, #tpu.memory_space<vmem>>, vector<8x1x12xf32>
    %32 = vector.broadcast %31 : vector<8x1x12xf32> to vector<8x8x12xf32>
    %33 = arith.addf %30, %32 : vector<8x8x12xf32>
    %34 = arith.truncf %33 : vector<8x8x12xf32> to vector<8x8x12xbf16>
    %35 = vector.extract_strided_slice %34 {offsets = [0, 0, 0], sizes = [8, 8, 4], strides = [1, 1, 1]} : vector<8x8x12xbf16> to vector<8x8x4xbf16>
    %36 = vector.extract_strided_slice %34 {offsets = [0, 0, 4], sizes = [8, 8, 4], strides = [1, 1, 1]} : vector<8x8x12xbf16> to vector<8x8x4xbf16>
    %37 = vector.extract_strided_slice %34 {offsets = [0, 0, 8], sizes = [8, 8, 4], strides = [1, 1, 1]} : vector<8x8x12xbf16> to vector<8x8x4xbf16>
    %c0_17 = arith.constant 0 : index
    %c0_18 = arith.constant 0 : index
    %c0_19 = arith.constant 0 : index
    %38 = vector.load %arg2[%c0_17, %c0_18, %c0_19] : memref<1x1x8xf32, #tpu.memory_space<vmem>>, vector<1x1x8xf32>
    %39 = vector.shape_cast %38 : vector<1x1x8xf32> to vector<1x8xf32>
    %cst_20 = arith.constant 0.000000e+00 : f32
    %40 = vector.broadcast %cst_20 : f32 to vector<1x8xf32>
    %41 = arith.cmpf ogt, %39, %40 : vector<1x8xf32>
    %cst_21 = arith.constant 0.000000e+00 : f32
    %42 = vector.broadcast %cst_21 : f32 to vector<1x8xf32>
    %cst_22 = arith.constant -1.000000e+09 : f32
    %43 = vector.broadcast %cst_22 : f32 to vector<1x8xf32>
    %44 = arith.select %41, %42, %43 : vector<1x8xi1>, vector<1x8xf32>
    "tpu.trace_start"() <{level = 10 : i32, message = "hqd,hkd->hqk"}> : () -> ()
    %cst_23 = arith.constant dense<0.000000e+00> : vector<8x8x8xf32>
    %45 = tpu.matmul %35, %36, %cst_23 {dimension_numbers = #tpu.dot_dimension_numbers<[2], [2], [1], [1], [0, 0, 0, 1, 1, 1], [0], [0]>} : vector<8x8x4xbf16>, vector<8x8x4xbf16>, vector<8x8x8xf32> -> vector<8x8x8xf32>
    "tpu.trace_stop"() : () -> ()
    %46 = vector.shape_cast %44 : vector<1x8xf32> to vector<1x1x8xf32>
    %47 = vector.broadcast %46 : vector<1x1x8xf32> to vector<8x8x8xf32>
    %48 = arith.addf %45, %47 : vector<8x8x8xf32>
    %cst_24 = arith.constant dense<0xFF800000> : vector<8x8xf32>
    %49 = vector.multi_reduction <maximumf>, %48, %cst_24 [2] : vector<8x8x8xf32> to vector<8x8xf32>
    %50 = vector.shape_cast %49 : vector<8x8xf32> to vector<8x8x1xf32>
    %51 = vector.broadcast %50 : vector<8x8x1xf32> to vector<8x8x8xf32>
    %52 = arith.subf %48, %51 : vector<8x8x8xf32>
    %53 = math.exp %52 : vector<8x8x8xf32>
    %cst_25 = arith.constant dense<0.000000e+00> : vector<8x8xf32>
    %54 = vector.multi_reduction <add>, %53, %cst_25 [2] : vector<8x8x8xf32> to vector<8x8xf32>
    %55 = vector.shape_cast %54 : vector<8x8xf32> to vector<8x8x1xf32>
    %56 = tpu.reciprocal %55 {approx = true} : vector<8x8x1xf32> -> vector<8x8x1xf32>
    %57 = vector.broadcast %56 : vector<8x8x1xf32> to vector<8x8x8xf32>
    %58 = arith.mulf %53, %57 : vector<8x8x8xf32>
    %59 = arith.truncf %58 : vector<8x8x8xf32> to vector<8x8x8xbf16>
    "tpu.trace_start"() <{level = 10 : i32, message = "hqk,hkd->hqd"}> : () -> ()
    %cst_26 = arith.constant dense<0.000000e+00> : vector<8x8x4xf32>
    %60 = tpu.matmul %59, %37, %cst_26 {dimension_numbers = #tpu.dot_dimension_numbers<[2], [1], [1], [2], [0, 0, 0, 1, 1, 2], [0], [0]>} : vector<8x8x8xbf16>, vector<8x8x4xbf16>, vector<8x8x4xf32> -> vector<8x8x4xf32>
    "tpu.trace_stop"() : () -> ()
    %61 = vector.extract_strided_slice %60 {offsets = [0, 0, 0], sizes = [1, 8, 4], strides = [1, 1, 1]} : vector<8x8x4xf32> to vector<1x8x4xf32>
    %62 = vector.shape_cast %61 : vector<1x8x4xf32> to vector<8x4xf32>
    %63 = vector.extract_strided_slice %60 {offsets = [1, 0, 0], sizes = [1, 8, 4], strides = [1, 1, 1]} : vector<8x8x4xf32> to vector<1x8x4xf32>
    %64 = vector.shape_cast %63 : vector<1x8x4xf32> to vector<8x4xf32>
    %65 = vector.extract_strided_slice %60 {offsets = [2, 0, 0], sizes = [1, 8, 4], strides = [1, 1, 1]} : vector<8x8x4xf32> to vector<1x8x4xf32>
    %66 = vector.shape_cast %65 : vector<1x8x4xf32> to vector<8x4xf32>
    %67 = vector.extract_strided_slice %60 {offsets = [3, 0, 0], sizes = [1, 8, 4], strides = [1, 1, 1]} : vector<8x8x4xf32> to vector<1x8x4xf32>
    %68 = vector.shape_cast %67 : vector<1x8x4xf32> to vector<8x4xf32>
    %69 = vector.extract_strided_slice %60 {offsets = [4, 0, 0], sizes = [1, 8, 4], strides = [1, 1, 1]} : vector<8x8x4xf32> to vector<1x8x4xf32>
    %70 = vector.shape_cast %69 : vector<1x8x4xf32> to vector<8x4xf32>
    %71 = vector.extract_strided_slice %60 {offsets = [5, 0, 0], sizes = [1, 8, 4], strides = [1, 1, 1]} : vector<8x8x4xf32> to vector<1x8x4xf32>
    %72 = vector.shape_cast %71 : vector<1x8x4xf32> to vector<8x4xf32>
    %73 = vector.extract_strided_slice %60 {offsets = [6, 0, 0], sizes = [1, 8, 4], strides = [1, 1, 1]} : vector<8x8x4xf32> to vector<1x8x4xf32>
    %74 = vector.shape_cast %73 : vector<1x8x4xf32> to vector<8x4xf32>
    %75 = vector.extract_strided_slice %60 {offsets = [7, 0, 0], sizes = [1, 8, 4], strides = [1, 1, 1]} : vector<8x8x4xf32> to vector<1x8x4xf32>
    %76 = vector.shape_cast %75 : vector<1x8x4xf32> to vector<8x4xf32>
    %77 = tpu.concatenate %62, %64, %66, %68, %70, %72, %74, %76 in 1 : vector<8x4xf32>, vector<8x4xf32>, vector<8x4xf32>, vector<8x4xf32>, vector<8x4xf32>, vector<8x4xf32>, vector<8x4xf32>, vector<8x4xf32> -> vector<8x32xf32>
    %78 = arith.truncf %77 : vector<8x32xf32> to vector<8x32xbf16>
    %c0_27 = arith.constant 0 : index
    %c0_28 = arith.constant 0 : index
    %79 = vector.load %arg7[%c0_27, %c0_28] : memref<32x32xbf16, #tpu.memory_space<vmem>>, vector<32x32xbf16>
    %cst_29 = arith.constant dense<0.000000e+00> : vector<8x32xf32>
    %80 = tpu.matmul %78, %79, %cst_29 {dimension_numbers = #tpu.dot_dimension_numbers<[1], [0], [0], [1], [0, 0, 1, 1], [], []>} : vector<8x32xbf16>, vector<32x32xbf16>, vector<8x32xf32> -> vector<8x32xf32>
    %81 = arith.addf %1, %80 : vector<8x32xf32>
    %c0_30 = arith.constant 0 : index
    %c0_31 = arith.constant 0 : index
    %82 = vector.load %arg8[%c0_30, %c0_31] : memref<1x32xf32, #tpu.memory_space<vmem>>, vector<1x32xf32>
    %83 = vector.broadcast %82 : vector<1x32xf32> to vector<8x32xf32>
    %84 = arith.addf %81, %83 : vector<8x32xf32>
    %c0_32 = arith.constant 0 : index
    %c0_33 = arith.constant 0 : index
    %85 = vector.load %arg9[%c0_32, %c0_33] : memref<1x32xf32, #tpu.memory_space<vmem>>, vector<1x32xf32>
    %c0_34 = arith.constant 0 : index
    %c0_35 = arith.constant 0 : index
    %86 = vector.load %arg10[%c0_34, %c0_35] : memref<1x32xf32, #tpu.memory_space<vmem>>, vector<1x32xf32>
    %cst_36 = arith.constant dense<0.000000e+00> : vector<8xf32>
    %87 = vector.multi_reduction <add>, %84, %cst_36 [1] : vector<8x32xf32> to vector<8xf32>
    %88 = vector.shape_cast %87 : vector<8xf32> to vector<8x1xf32>
    %cst_37 = arith.constant 3.200000e+01 : f32
    %89 = vector.broadcast %cst_37 : f32 to vector<8x1xf32>
    %90 = arith.divf %88, %89 : vector<8x1xf32>
    %91 = vector.broadcast %90 : vector<8x1xf32> to vector<8x32xf32>
    %92 = arith.subf %84, %91 : vector<8x32xf32>
    %93 = arith.mulf %92, %92 : vector<8x32xf32>
    %cst_38 = arith.constant dense<0.000000e+00> : vector<8xf32>
    %94 = vector.multi_reduction <add>, %93, %cst_38 [1] : vector<8x32xf32> to vector<8xf32>
    %95 = vector.shape_cast %94 : vector<8xf32> to vector<8x1xf32>
    %cst_39 = arith.constant 3.200000e+01 : f32
    %96 = vector.broadcast %cst_39 : f32 to vector<8x1xf32>
    %97 = arith.divf %95, %96 : vector<8x1xf32>
    %98 = vector.broadcast %90 : vector<8x1xf32> to vector<8x32xf32>
    %99 = arith.subf %84, %98 : vector<8x32xf32>
    %cst_40 = arith.constant 9.99999974E-6 : f32
    %100 = vector.broadcast %cst_40 : f32 to vector<8x1xf32>
    %101 = arith.addf %97, %100 : vector<8x1xf32>
    %102 = math.rsqrt %101 : vector<8x1xf32>
    %103 = vector.broadcast %102 : vector<8x1xf32> to vector<8x32xf32>
    %104 = arith.mulf %99, %103 : vector<8x32xf32>
    %105 = vector.broadcast %85 : vector<1x32xf32> to vector<8x32xf32>
    %106 = arith.mulf %104, %105 : vector<8x32xf32>
    %107 = vector.broadcast %86 : vector<1x32xf32> to vector<8x32xf32>
    %108 = arith.addf %106, %107 : vector<8x32xf32>
    %109 = arith.truncf %108 : vector<8x32xf32> to vector<8x32xbf16>
    %c0_41 = arith.constant 0 : index
    %c0_42 = arith.constant 0 : index
    %110 = vector.load %arg11[%c0_41, %c0_42] : memref<32x128xbf16, #tpu.memory_space<vmem>>, vector<32x128xbf16>
    %cst_43 = arith.constant dense<0.000000e+00> : vector<8x128xf32>
    %111 = tpu.matmul %109, %110, %cst_43 {dimension_numbers = #tpu.dot_dimension_numbers<[1], [0], [0], [1], [0, 0, 1, 1], [], []>} : vector<8x32xbf16>, vector<32x128xbf16>, vector<8x128xf32> -> vector<8x128xf32>
    %c0_44 = arith.constant 0 : index
    %c0_45 = arith.constant 0 : index
    %112 = vector.load %arg12[%c0_44, %c0_45] : memref<1x128xf32, #tpu.memory_space<vmem>>, vector<1x128xf32>
    %113 = vector.broadcast %112 : vector<1x128xf32> to vector<8x128xf32>
    %114 = arith.addf %111, %113 : vector<8x128xf32>
    %cst_46 = arith.constant 5.000000e-01 : f32
    %115 = vector.broadcast %cst_46 : f32 to vector<8x128xf32>
    %116 = arith.mulf %115, %114 : vector<8x128xf32>
    %cst_47 = arith.constant 4.471500e-02 : f32
    %117 = vector.broadcast %cst_47 : f32 to vector<8x128xf32>
    %118 = arith.mulf %117, %114 : vector<8x128xf32>
    %119 = arith.mulf %118, %114 : vector<8x128xf32>
    %120 = arith.mulf %119, %114 : vector<8x128xf32>
    %121 = arith.addf %114, %120 : vector<8x128xf32>
    %cst_48 = arith.constant 0.797884583 : f32
    %122 = vector.broadcast %cst_48 : f32 to vector<8x128xf32>
    %123 = arith.mulf %122, %121 : vector<8x128xf32>
    %124 = math.tanh %123 : vector<8x128xf32>
    %cst_49 = arith.constant 1.000000e+00 : f32
    %125 = vector.broadcast %cst_49 : f32 to vector<8x128xf32>
    %126 = arith.addf %125, %124 : vector<8x128xf32>
    %127 = arith.mulf %116, %126 : vector<8x128xf32>
    %128 = arith.truncf %127 : vector<8x128xf32> to vector<8x128xbf16>
    %c0_50 = arith.constant 0 : index
    %c0_51 = arith.constant 0 : index
    %129 = vector.load %arg13[%c0_50, %c0_51] : memref<128x32xbf16, #tpu.memory_space<vmem>>, vector<128x32xbf16>
    %cst_52 = arith.constant dense<0.000000e+00> : vector<8x32xf32>
    %130 = tpu.matmul %128, %129, %cst_52 {dimension_numbers = #tpu.dot_dimension_numbers<[1], [0], [0], [1], [0, 0, 1, 1], [], []>} : vector<8x128xbf16>, vector<128x32xbf16>, vector<8x32xf32> -> vector<8x32xf32>
    %131 = arith.addf %84, %130 : vector<8x32xf32>
    %c0_53 = arith.constant 0 : index
    %c0_54 = arith.constant 0 : index
    %132 = vector.load %arg14[%c0_53, %c0_54] : memref<1x32xf32, #tpu.memory_space<vmem>>, vector<1x32xf32>
    %133 = vector.broadcast %132 : vector<1x32xf32> to vector<8x32xf32>
    %134 = arith.addf %131, %133 : vector<8x32xf32>
    %c0_55 = arith.constant 0 : index
    %c0_56 = arith.constant 0 : index
    %c0_57 = arith.constant 0 : index
    %135 = vector.load %arg15[%c0_55, %c0_56, %c0_57] : memref<1x8x32xf32, #tpu.memory_space<vmem>>, vector<1x8x32xf32>
    %136 = vector.shape_cast %135 : vector<1x8x32xf32> to vector<8x32xf32>
    %137 = vector.shape_cast %134 : vector<8x32xf32> to vector<1x8x32xf32>
    tpu.vector_store %arg15[%c0_55, %c0_56, %c0_57], %137 {strides = array<i32>} : memref<1x8x32xf32, #tpu.memory_space<vmem>>, vector<1x8x32xf32>,
    return
  }
  func.func @transform_0(%arg0: i32) -> (i32, i32, i32) {
    %c0_i32 = arith.constant 0 : i32
    %c0_i32_0 = arith.constant 0 : i32
    %c0_i32_1 = arith.constant 0 : i32
    return %arg0, %c0_i32, %c0_i32_0 : i32, i32, i32
  }
  func.func @transform_1(%arg0: i32) -> (i32, i32, i32) {
    %c0_i32 = arith.constant 0 : i32
    %c0_i32_0 = arith.constant 0 : i32
    %c0_i32_1 = arith.constant 0 : i32
    return %arg0, %c0_i32, %c0_i32_0 : i32, i32, i32
  }
  func.func @transform_2(%arg0: i32) -> (i32, i32) {
    %c0_i32 = arith.constant 0 : i32
    %c0_i32_0 = arith.constant 0 : i32
    %c0_i32_1 = arith.constant 0 : i32
    return %c0_i32, %c0_i32_0 : i32, i32
  }
  func.func @transform_3(%arg0: i32) -> (i32, i32) {
    %c0_i32 = arith.constant 0 : i32
    %c0_i32_0 = arith.constant 0 : i32
    %c0_i32_1 = arith.constant 0 : i32
    return %c0_i32, %c0_i32_0 : i32, i32
  }
  func.func @transform_4(%arg0: i32) -> (i32, i32, i32) {
    %c0_i32 = arith.constant 0 : i32
    %c0_i32_0 = arith.constant 0 : i32
    %c0_i32_1 = arith.constant 0 : i32
    %c0_i32_2 = arith.constant 0 : i32
    return %c0_i32, %c0_i32_0, %c0_i32_1 : i32, i32, i32
  }
  func.func @transform_5(%arg0: i32) -> (i32, i32, i32) {
    %c0_i32 = arith.constant 0 : i32
    %c0_i32_0 = arith.constant 0 : i32
    %c0_i32_1 = arith.constant 0 : i32
    %c0_i32_2 = arith.constant 0 : i32
    return %c0_i32, %c0_i32_0, %c0_i32_1 : i32, i32, i32
  }
  func.func @transform_6(%arg0: i32) -> (i32, i32) {
    %c0_i32 = arith.constant 0 : i32
    %c0_i32_0 = arith.constant 0 : i32
    %c0_i32_1 = arith.constant 0 : i32
    return %c0_i32, %c0_i32_0 : i32, i32
  }
  func.func @transform_7(%arg0: i32) -> (i32, i32) {
    %c0_i32 = arith.constant 0 : i32
    %c0_i32_0 = arith.constant 0 : i32
    %c0_i32_1 = arith.constant 0 : i32
    return %c0_i32, %c0_i32_0 : i32, i32
  }
  func.func @transform_8(%arg0: i32) -> (i32, i32) {
    %c0_i32 = arith.constant 0 : i32
    %c0_i32_0 = arith.constant 0 : i32
    %c0_i32_1 = arith.constant 0 : i32
    return %c0_i32, %c0_i32_0 : i32, i32
  }
  func.func @transform_9(%arg0: i32) -> (i32, i32) {
    %c0_i32 = arith.constant 0 : i32
    %c0_i32_0 = arith.constant 0 : i32
    %c0_i32_1 = arith.constant 0 : i32
    return %c0_i32, %c0_i32_0 : i32, i32
  }
  func.func @transform_10(%arg0: i32) -> (i32, i32) {
    %c0_i32 = arith.constant 0 : i32
    %c0_i32_0 = arith.constant 0 : i32
    %c0_i32_1 = arith.constant 0 : i32
    return %c0_i32, %c0_i32_0 : i32, i32
  }
  func.func @transform_11(%arg0: i32) -> (i32, i32) {
    %c0_i32 = arith.constant 0 : i32
    %c0_i32_0 = arith.constant 0 : i32
    %c0_i32_1 = arith.constant 0 : i32
    return %c0_i32, %c0_i32_0 : i32, i32
  }
  func.func @transform_12(%arg0: i32) -> (i32, i32) {
    %c0_i32 = arith.constant 0 : i32
    %c0_i32_0 = arith.constant 0 : i32
    %c0_i32_1 = arith.constant 0 : i32
    return %c0_i32, %c0_i32_0 : i32, i32
  }
  func.func @transform_13(%arg0: i32) -> (i32, i32) {
    %c0_i32 = arith.constant 0 : i32
    %c0_i32_0 = arith.constant 0 : i32
    %c0_i32_1 = arith.constant 0 : i32
    return %c0_i32, %c0_i32_0 : i32, i32
  }
  func.func @transform_14(%arg0: i32) -> (i32, i32, i32) {
    %c0_i32 = arith.constant 0 : i32
    %c0_i32_0 = arith.constant 0 : i32
    %c0_i32_1 = arith.constant 0 : i32
    return %arg0, %c0_i32, %c0_i32_0 : i32, i32, i32
  }
}

</mosaic_0001>

<bundles_post_ra>
// kernel: tpu_custom_call.1
= control target key start
LH: loop header
LB: loop body
LE: loop exit
PB: predicated region body
PF: predicated region fallthrough
CT: control target
= control target key end

     0   :  { %s3583_s0 = inlined_call_operand.hbm [shape: f32[2,8,32], index: 0, kind: input, shape index: {}, may-alias: {0,14}]   ;;  %s3584_s1 = inlined_call_operand.vmem [shape: f32[2,1,8], index: 1, kind: input, shape index: {}]   ;;  %s3585_s2 = inlined_call_operand.vmem [shape: f32[1,32], index: 2, kind: input, shape index: {}]   ;;  %s3586_s3 = inlined_call_operand.vmem [shape: f32[1,32], index: 3, kind: input, shape index: {}]   ;;  %s3587_s4 = inlined_call_operand.vmem [shape: bf16[8,32,12], index: 4, kind: input, shape index: {}]   ;;  %s3588_s5 = inlined_call_operand.vmem [shape: f32[8,1,12], index: 5, kind: input, shape index: {}]   ;;  %s3589_s6 = inlined_call_operand.vmem [shape: bf16[32,32], index: 6, kind: input, shape index: {}]   ;;  %s3590_s7 = inlined_call_operand.vmem [shape: f32[1,32], index: 7, kind: input, shape index: {}]   ;;  %s3591_s8 = inlined_call_operand.vmem [shape: f32[1,32], index: 8, kind: input, shape index: {}]   ;;  %s3592_s9 = inlined_call_operand.vmem [shape: f32[1,32], index: 9, kind: input, shape index: {}]   ;;  %s3593_s10 = inlined_call_operand.vmem [shape: bf16[32,128], index: 10, kind: input, shape index: {}]   ;;  %s3594_s11 = inlined_call_operand.vmem [shape: f32[1,128], index: 11, kind: input, shape index: {}]   ;;  %s3595_s12 = inlined_call_operand.vmem [shape: bf16[128,32], index: 12, kind: input, shape index: {}]   ;;  %s3596_s13 = inlined_call_operand.vmem [shape: f32[1,32], index: 13, kind: input, shape index: {}]   ;;  %s3597_s14 = inlined_call_operand.hbm [shape: f32[2,8,32], index: 14, kind: output, shape index: {}, may-alias: {0,14}]  }
   0x1   :  { %3604 = sst [smem:[#allocation12_spill]] %s3597_s14 }
   0x2   :  { %19 = vsyncpa [#allocation3], 0 }
   0x3   :  { %21 = vsyncpa [#allocation3 + $0x1], 0 }
   0x4   :  { %22 = vsyncpa [#allocation4], 0 }
   0x5   :  { %24 = vsyncpa [#allocation4 + $0x1], 0  ;;  %s3012_s29 = smov 0   ;;  %s3014_s30 = smov 0  }
   0x6   :  { %s3016_s15 = smov 0   ;;  %s3018_s16 = smov 0  }
   0x7 LB: > { %3605 = sst [smem:[#allocation8_spill]] %s2909_s29  ;;  %s3033_s17 = sadd.s32 4294967295, %s2921_s16   ;;  %s2921_s16 = sphi %s3018_s16, %s3621_s16   ;;  %s2917_s15 = sphi %s3016_s15, %s3623_s15   ;;  %s2913_s30 = sphi %s3014_s30, %s3625_s30   ;;  %s2909_s29 = sphi %s3012_s29, %s3624_s29  }
   0x8   : > { %3606 = sst [smem:[#allocation9_spill]] %s2917_s15  ;;  %s2352_s18 = sadd.s32 4294967294, %s2921_s16  }
   0x9   : > { %s3037_s19 = sadd.s32 1, %s2921_s16   ;;  %s37_s20 = sadd.s32 1, %s2917_s15 }
   0xa   : > { %3607 = sst [smem:[#allocation10_spill]] %s3037_s19  ;;  %s34_s21 = ssub.s32 %s2921_s16, %s3037_s19 }
   0xb   : > { %p44_p0 = scmp.ne.s32.totalorder %s2917_s15, %s2913_s30  ;;  %p35_p1 = scmp.eq.s32.totalorder %s34_s21, 0 }
   0xc   : > { %p45_p2 = scmp.eq.s32.totalorder %s2921_s16, 0  ;;  %p50_p3 = scmp.ne.s32.totalorder %s2913_s30, %s2909_s29 }
   0xd   : > { %p51_p4 = scmp.eq.s32.totalorder %s3033_s17, 0  ;;  %p352_p7 = scmp.eq.s32.totalorder %s3033_s17, 1 }
   0xe   : > { %s3049_s22 = scalar_select %p35_p1, %s2917_s15, %s37_s20  }
   0xf   : > { %p3051_p5 = por %p45_p2, %p44_p0  ;;  %p3055_p6 = por %p51_p4, %p50_p3 }
  0x10   : > { %3608 = sst [smem:[#allocation11_spill]] %s3049_s22  ;;  %p358_p8 = scmp.eq.s32.totalorder %s2352_s18, 1 }
  0x11   : > { %p2712_p10 = scmp.lt.s32.totalorder %s2921_s16, 2  ;;  %p3062_p11 = por %p352_p7, %p44_p0 }
  0x12   : > { %p3066_p12 = por %p358_p8, %p50_p3  ;;  %s414_s27 = sand.u32 1, %s2917_s15  }
  0x13   : > { %s3611_s25 = scalar_select %p3062_p11, 1, 0 }
  0x14   : > { %s3612_s26 = scalar_select %p3066_p12, 1, 0 }
  0x15   : > { %s2356_s28 = sshll.u32 %s2921_s16, 7  ;;  %s2355_s20 = sshll.u32 %s414_s27, 3 }
  0x16   : > { %s3075_s19 = scalar_lea.hbm %s3583_s0, %s2356_s28  ;;  %s418_s18 = scalar_lea.vmem [#allocation2], %s2355_s20 }
  0x17   : > { %s425_s29 = sshll.u32 %s418_s18, 4  ;;  %p3079_p13 = pnand %p2712_p10, %p3051_p5  ;;  %s3083_s29 = int_to_ptr.vmem [resolvable:$true] %s425_s29 }
  0x18   : > { %s415_s22 = scalar_lea.sflag [#allocation3], %s414_s27  ;;  %s2825_s28 = scalar_lea.hbm %s3075_s19, 128 }
  0x19   : > { %p2826_p2 = scmp.ne.s32.totalorder %s3075_s19, %s2825_s28  ;;  %p2827_p3 = pneg %p3079_p13 }
  0x1a   : > { %s2830_s21 = scalar_lea.hbm %s3583_s0, 256  ;;  %p2831_p5 = scmp.lt.u32.totalorder %s3075_s19, %s3583_s0 }
  0x1b   : > { %p2828_p4 = pnand %p2827_p3, %p2826_p2  ;;  %p2832_p8 = scmp.lt.u32.totalorder %s2830_s21, %s2825_s28 }
  0x1c   : > { %p2834_p9 = scmp.lt.u32.totalorder %s2825_s28, %s3075_s19 }
  0x1d   : > { %p2829_p7 = pneg %p2828_p4  ;;  %p2833_p10 = por %p2832_p8, %p2831_p5 }
  0x1f   : > { %p2835_p0 = por %p2834_p9, %p2833_p10 }
  0x21   : > { %p2836_p1 = pnand %p2835_p0, %p2829_p7 }
  0x23   : > { %2839 = shalt.err (!%p2836_p1)
}
  0x24   : > { %s2840_s27 = scalar_lea.vmem %s3083_s29, 128  ;;  %s2923_s23 = smov [#allocation2]  }
  0x25   : > { %p2841_p2 = scmp.ne.s32.totalorder %s3083_s29, %s2840_s27  ;;  %s2845_s20 = sshll.u32 %s2923_s23, 4  ;;  %s2846_s20 = int_to_ptr.vmem [resolvable:$false] %s2845_s20 }
  0x26   : > { %s2847_s15 = scalar_lea.vmem %s2846_s20, 256  ;;  %p2848_p11 = scmp.lt.s32.totalorder %s3083_s29, %s2846_s20 }
  0x27   : > { %p2843_p4 = pnand %p2841_p2, %p2827_p3  ;;  %p2849_p5 = scmp.lt.s32.totalorder %s2847_s15, %s2840_s27 }
  0x29   : > { %p2844_p12 = pneg %p2843_p4  ;;  %p2850_p8 = por %p2849_p5, %p2848_p11 }
  0x2b   : > { %p2851_p9 = pnand %p2850_p8, %p2844_p12 }
  0x2d   : > { %2854 = shalt.err (!%p2851_p9)
}
  0x2e   : > { %2707 = dma.hbm_to_vmem [thread:$0]  (!%p3079_p13), %s3075_s19, 128, %s3083_s29, %s415_s22  }
  0x2f   : > { %p3614_p0 = scmp.lt.s32.totalorder %s2921_s16, 3  ;;  %p3615_p1 = scmp.ge.s32.totalorder %s2921_s16, 1 }
  0x31   : > { %p437_p3 = pnand %p3615_p1, %p3614_p0 }
  0x32   : > { %s3117_s28 = sand.u32 (!%p437_p3), 1, %s2913_s30  }
  0x33   : > { %440 = sbr.rel (%p437_p3) target bundleno = 2654 (0xa5e), region = 76  ;;  %s2358_s21 = sshll.u32 (!%p437_p3), %s3117_s28, 3 }
  0x34   : > { %s443_s18 = scalar_lea.sflag (!%p437_p3), [#allocation3], %s3117_s28  ;;  %s3123_s14 = scalar_lea.vmem (!%p437_p3), [#allocation2], %s2358_s21 }
  0x3a   : > { %2900 = dma.done.wait (%p3055_p6), %s443_s18, 128  }
  0x3b   : > { %2902 = vsyncadd (%p3055_p6), %s443_s18, 4294967168  ;;  %vm501_vm0 = vcmask 261120   ;;  %v498_v0 = vld [vmem:[%s3123_s14] sm:$0xff]  ;;  %v2924_v9 = vmov 0.0   ;;  %vm2925_vm1 = vmmov 0   ;;  %v2762_v21 = vld [vmem:[%s3587_s4 + $0x10] sm:$0xff]  }
  0x3c   : > { %v502_v1 = vsel %vm501_vm0, %v498_v0, 0.0  ;;  %v2758_v7 = vld [vmem:[%s3587_s4] sm:$0xff]   ;;  %2504 = vmatprep.subr.bf16.mxu1 %v2924_v9  ;;  %2536 = vmatprep.subr.bf16.mxu0 %v2924_v9  ;;  %v2760_v10 = vld [vmem:[%s3587_s4 + $0x8] sm:$0xff]   ;;  %v2764_v24 = vld [vmem:[%s3587_s4 + $0x18] sm:$0xff]   ;;  %s2926_s22 = smov 124   ;;  %vm1058_vm2 = vcmask 31744  }
  0x3d   : > { %503 = vadd.xlane.f32.xlu0 %v502_v1  ;;  %v2759_v8 = vld [vmem:[%s3587_s4 + $0x40] sm:$0xff]   ;;  %2505 = vmatpush3.bf16.msra.mxu1 %v2758_v7  ;;  %v2761_v11 = vld [vmem:[%s3587_s4 + $0x48] sm:$0xff]   ;;  %v2768_v28 = vld [vmem:[%s3587_s4 + $0x30] sm:$0xff]   ;;  %p494_p6 = scmp.lt.s32.totalorder %s3033_s17, 1  ;;  %vm1448_vm4 = vcmask 64512   ;;  %s2928_s27 = smov 120  }
  0x3e   : > { %2537 = vmatpush3.bf16.msra.mxu0 %v2759_v8  ;;  %2506 = vmatprep.subr.bf16.mxu1 %v2924_v9  ;;  %v2360_v16 = vld [vmem:[%s3585_s2] ss:$0 sm:$0xff]  ;;  %v2765_v25 = vld [vmem:[%s3587_s4 + $0x68] sm:$0xff]   ;;  %v2769_v29 = vld [vmem:[%s3587_s4 + $0x38] sm:$0xff]   ;;  %vm1550_vm5 = vcmask 1043456   ;;  %s2929_s23 = smov 4  }
  0x3f   : > { %2538 = vmatprep.subr.bf16.mxu0 %v2924_v9  ;;  %2508 = vmatprep.mubr.msk.bf16.mxu1 %vm2925_vm1, %v2924_v9  ;;  %v2361_v18 = vld [vmem:[%s3586_s3] ss:$0 sm:$0xff]  ;;  %v2767_v27 = vld [vmem:[%s3587_s4 + $0x28] sm:$0xff]   ;;  %v2770_v30 = vld [vmem:[%s3587_s4 + $0x50] sm:$0xff]   ;;  %s2930_s20 = smov 8   ;;  %s2931_s15 = smov 12  }
  0x40   : > { %2540 = vmatprep.mubr.msk.bf16.mxu0 %vm2925_vm1, %v2924_v9  ;;  %v2763_v22 = vld [vmem:[%s3587_s4 + $0x60] sm:$0xff]   ;;  %v2771_v31 = vld [vmem:[%s3587_s4 + $0x58] sm:$0xff]   ;;  %v2772_v32 = vld [vmem:[%s3587_s4 + $0x70] sm:$0xff]   ;;  %s2932_s18 = smov 20   ;;  %vm1960_vm6 = vcmask 97280   ;;  %vm1962_vm7 = vcmask 130048  }
  0x41   : > { %2507 = vmatpush3.bf16.msra.mxu1 %v2760_v10  ;;  %v2766_v26 = vld [vmem:[%s3587_s4 + $0x20] sm:$0xff]   ;;  %v2773_v33 = vld [vmem:[%s3587_s4 + $0x78] sm:$0xff]   ;;  %vm1964_vm8 = vcmask 162816   ;;  %vm1966_vm9 = vcmask 195584   ;;  %vm1968_vm10 = vcmask 228352   ;;  %s3616_s19 = sld [smem:[#allocation12_spill]] }
  0x42   : > { %2539 = vmatpush3.bf16.msra.mxu0 %v2761_v11  ;;  %2512 = vmatprep.subr.bf16.mxu1 %v2924_v9  ;;  %v2362_v34 = vld [vmem:[%s3588_s5] ss:$0 sm:$0xff]  ;;  %v2363_v45 = vld [vmem:[%s3588_s5 + $0x1] ss:$0 sm:$0xff]  ;;  %v2364_v56 = vld [vmem:[%s3588_s5 + $0x2] ss:$0 sm:$0xff] }
  0x43   : > { %2552 = vmatprep.subr.bf16.mxu0 %v2924_v9  ;;  %v2365_v63 = vld [vmem:[%s3588_s5 + $0x3] ss:$0 sm:$0xff]  ;;  %v2367_v8 = vld [vmem:[%s3588_s5 + $0x5] ss:$0 sm:$0xff]  ;;  %v2368_v11 = vld [vmem:[%s3588_s5 + $0x6] ss:$0 sm:$0xff] }
  0x44   : > { %p3617_p12 = scmp.ne.s32.totalorder %s3611_s25, 0 }
  0xca   : > { %v504_v2 = vpop.xlane.xlu0 %503 }
  0xcb   : > { %v506_v3 = vmul.f32 0.03125, %v504_v2 }
  0xcd   : > { %v507_v4 = vsub.f32 %v498_v0, %v506_v3  ;;  %v2366_v0 = vld [vmem:[%s3588_s5 + $0x4] ss:$0 sm:$0xff] }
  0xcf   : > { %v508_v5 = vmul.f32 %v507_v4, %v507_v4 }
  0xd1   : > { %v509_v6 = vsel %vm501_vm0, %v508_v5, 0.0 }
  0xd2   : > { %510 = vadd.xlane.f32.xlu0 %v509_v6 }
 0x15f   : > { %v511_v12 = vpop.xlane.xlu0 %510 }
 0x160   : > { %v512_v13 = vmul.f32 0.03125, %v511_v12 }
 0x162   : > { %v513_v14 = vadd.f32 1e-05, %v512_v13 }
 0x164   : > { %2786 = vrsqrt.f32 %v513_v14 }
 0x16e   : > { %v2787_v15 = vpop.eup %2786 }
 0x16f   : > { %v515_v17 = vmul.f32 %v2787_v15, %v507_v4 }
 0x171   : > { %v522_v19 = vmul.f32 %v2360_v16, %v515_v17 }
 0x173   : > { %v529_v20 = vadd.f32 %v2361_v18, %v522_v19  ;;  %v2369_v19 = vld [vmem:[%s3588_s5 + $0x7] ss:$0 sm:$0xff] }
 0x175   : > { %v530_v23 = vpack.c.bf16 %v529_v20, %v529_v20 }
 0x177   : > { %2509 = vmatmul.mubr.msk.bf16.vlgmr.msra.gmra.mrb[0].mxu1 %vm501_vm0, %v530_v23  ;;  %2541 = vmatmul.mubr.msk.bf16.vlgmr.msra.gmra.mrb[0].mxu0 %vm501_vm0, %v530_v23 }
 0x178   : > { %2513 = vmatpush3.bf16.msra.mxu1 %v2762_v21  ;;  %2553 = vmatpush3.bf16.msra.mxu0 %v2763_v22 }
 0x179   : > { %2514 = vmatprep.subr.bf16.mxu1 %v2924_v9  ;;  %2554 = vmatprep.subr.bf16.mxu0 %v2924_v9 }
 0x17a   : > { %2516 = vmatprep.mubr.msk.bf16.mxu1 %vm2925_vm1, %v2924_v9  ;;  %2556 = vmatprep.mubr.msk.bf16.mxu0 %vm2925_vm1, %v2924_v9 }
 0x17c   : > { %2515 = vmatpush3.bf16.msra.mxu1 %v2764_v24  ;;  %2555 = vmatpush3.bf16.msra.mxu0 %v2765_v25 }
 0x17d   : > { %2520 = vmatprep.subr.bf16.mxu1 %v2924_v9  ;;  %2568 = vmatprep.subr.bf16.mxu0 %v2924_v9 }
 0x17f   : > { %2517 = vmatmul.mubr.msk.bf16.vlgmr.msra.gmra.mrb[4].mxu1 %vm501_vm0, %v530_v23  ;;  %2557 = vmatmul.mubr.msk.bf16.vlgmr.msra.gmra.mrb[4].mxu0 %vm501_vm0, %v530_v23 }
 0x180   : > { %2521 = vmatpush3.bf16.msra.mxu1 %v2766_v26  ;;  %2524 = vmatprep.mubr.msk.bf16.mxu1 %vm2925_vm1, %v2924_v9 }
 0x181   : > { %2522 = vmatprep.subr.bf16.mxu1 %v2924_v9  ;;  %2570 = vmatprep.mubr.msk.bf16.mxu0 %vm2925_vm1, %v2924_v9 }
 0x184   : > { %2523 = vmatpush3.bf16.msra.mxu1 %v2767_v27 }
 0x185   : > { %2528 = vmatprep.subr.bf16.mxu1 %v2924_v9 }
 0x187   : > { %2525 = vmatmul.mubr.msk.bf16.vlgmr.msra.gmra.mrb[8].mxu1 %vm501_vm0, %v530_v23 }
 0x188   : > { %2529 = vmatpush3.bf16.msra.mxu1 %v2768_v28  ;;  %2532 = vmatprep.mubr.msk.bf16.mxu1 %vm2925_vm1, %v2924_v9 }
 0x189   : > { %2530 = vmatprep.subr.bf16.mxu1 %v2924_v9 }
 0x18c   : > { %2531 = vmatpush3.bf16.msra.mxu1 %v2769_v29 }
 0x18d   : > { %2544 = vmatprep.subr.bf16.mxu1 %v2924_v9 }
 0x18f   : > { %2533 = vmatmul.mubr.msk.bf16.vlgmr.msra.gmra.mrb[12].mxu1 %vm501_vm0, %v530_v23 }
 0x190   : > { %2545 = vmatpush3.bf16.msra.mxu1 %v2770_v30  ;;  %2548 = vmatprep.mubr.msk.bf16.mxu1 %vm2925_vm1, %v2924_v9 }
 0x191   : > { %2546 = vmatprep.subr.bf16.mxu1 %v2924_v9 }
 0x194   : > { %2547 = vmatpush3.bf16.msra.mxu1 %v2771_v31 }
 0x195   : > { %2560 = vmatprep.subr.bf16.mxu1 %v2924_v9 }
 0x197   : > { %2549 = vmatmul.mubr.msk.bf16.vlgmr.msra.gmra.mrb[16].mxu1 %vm501_vm0, %v530_v23 }
 0x198   : > { %2561 = vmatpush3.bf16.msra.mxu1 %v2772_v32  ;;  %2564 = vmatprep.mubr.msk.bf16.mxu1 %vm2925_vm1, %v2924_v9 }
 0x199   : > { %2562 = vmatprep.subr.bf16.mxu1 %v2924_v9 }
 0x19c   : > { %2563 = vmatpush3.bf16.msra.mxu1 %v2773_v33 }
 0x19d   : > { %2574 = vmatprep.subr.bf16.mxu1 %v2924_v9 }
 0x19f   : > { %2565 = vmatmul.mubr.msk.bf16.vlgmr.msra.gmra.mrb[20].mxu1 %vm501_vm0, %v530_v23 }
 0x1a0   : > { %2576 = vmatprep.mubr.msk.bf16.mxu1 %vm2925_vm1, %v2924_v9 }
 0x24a   : > { %v668_v35 = vpop.f32.mrb[0].mxu1  ;;  %v876_v36 = vpop.f32.mrb[0].mxu0 }
 0x24b   : > { %v669_v37 = vadd.f32 %v2362_v34, %v668_v35  ;;  %v2510_v38 = vpop.f32.mrb[1].mxu1  ;;  %v2542_v39 = vpop.f32.mrb[1].mxu0  ;;  %v877_v5 = vadd.f32 %v2366_v0, %v876_v36 }
 0x24c   : > { %v671_v40 = vpop.f32.mrb[2].mxu1  ;;  %v879_v41 = vpop.f32.mrb[2].mxu0 }
 0x24d   : > { %v3235_v42 = vpack.c.bf16 %v669_v37, %v669_v37  ;;  %v2511_v43 = vpop.f32.mrb[3].mxu1  ;;  %v2543_v44 = vpop.f32.mrb[3].mxu0  ;;  %v3266_v10 = vpack.c.bf16 %v877_v5, %v877_v5 }
 0x24e   : > { %v1050_v44 = vlaneseq }
 0x24f   : > { %1056 = vrot.lane.b32.xlu1 %v3235_v42, %s2926_s22 }
 0x252   : > { %v720_v46 = vpop.f32.mrb[4].mxu1  ;;  %v980_v47 = vpop.f32.mrb[4].mxu0 }
 0x253   : > { %v721_v48 = vadd.f32 %v2363_v45, %v720_v46  ;;  %v2518_v49 = vpop.f32.mrb[5].mxu1  ;;  %v2558_v50 = vpop.f32.mrb[5].mxu0  ;;  %v981_v16 = vadd.f32 %v2368_v11, %v980_v47  ;;  %v1051_v46 = vshrl.u32 %v1050_v44, 7 }
 0x254   : > { %v723_v51 = vpop.f32.mrb[6].mxu1  ;;  %v983_v52 = vpop.f32.mrb[6].mxu0 }
 0x255   : > { %v3242_v53 = vpack.c.bf16 %v721_v48, %v721_v48  ;;  %v2519_v54 = vpop.f32.mrb[7].mxu1  ;;  %v2559_v55 = vpop.f32.mrb[7].mxu0  ;;  %v3280_v20 = vpack.c.bf16 %v981_v16, %v981_v16  ;;  %v1052_v47 = vsub.s32 0, %v1051_v46  ;;  %v2927_v48 = vmov -1e+09  }
 0x257   : > { %1106 = vrot.lane.b32.xlu1 %v3242_v53, %s2926_s22 }
 0x25a   : > { %v772_v57 = vpop.f32.mrb[8].mxu1 }
 0x25b   : > { %v773_v58 = vadd.f32 %v2364_v56, %v772_v57  ;;  %v2526_v59 = vpop.f32.mrb[9].mxu1 }
 0x25c   : > { %v775_v60 = vpop.f32.mrb[10].mxu1 }
 0x25d   : > { %v3249_v61 = vpack.c.bf16 %v773_v58, %v773_v58  ;;  %v2527_v62 = vpop.f32.mrb[11].mxu1 }
 0x25f   : > { %1155 = vrot.lane.b32.xlu0 %v3249_v61, %s2926_s22 }
 0x262   : > { %v824_v1 = vpop.f32.mrb[12].mxu1 }
 0x263   : > { %v825_v2 = vadd.f32 %v2365_v63, %v824_v1  ;;  %v2534_v3 = vpop.f32.mrb[13].mxu1 }
 0x264   : > { %v827_v4 = vpop.f32.mrb[14].mxu1 }
 0x265   : > { %v3259_v6 = vpack.c.bf16 %v825_v2, %v825_v2  ;;  %v2535_v7 = vpop.f32.mrb[15].mxu1 }
 0x267   : > { %1204 = vrot.lane.b32.xlu1 %v3259_v6, %s2926_s22 }
 0x26a   : > { %v928_v12 = vpop.f32.mrb[16].mxu1 }
 0x26b   : > { %v929_v13 = vadd.f32 %v2367_v8, %v928_v12  ;;  %1253 = vrot.lane.b32.xlu1 %v3266_v10, %s2926_s22  ;;  %v2550_v14 = vpop.f32.mrb[17].mxu1 }
 0x26c   : > { %v931_v15 = vpop.f32.mrb[18].mxu1 }
 0x26d   : > { %v3273_v17 = vpack.c.bf16 %v929_v13, %v929_v13  ;;  %v2551_v18 = vpop.f32.mrb[19].mxu1 }
 0x26f   : > { %1302 = vrot.lane.b32.xlu1 %v3273_v17, %s2926_s22 }
 0x272   : > { %v1032_v21 = vpop.f32.mrb[20].mxu1 }
 0x273   : > { %v1033_v22 = vadd.f32 %v2369_v19, %v1032_v21  ;;  %1351 = vrot.lane.b32.xlu1 %v3280_v20, %s2926_s22  ;;  %v2566_v23 = vpop.f32.mrb[21].mxu1 }
 0x274   : > { %v1035_v24 = vpop.f32.mrb[22].mxu1 }
 0x275   : > { %v3284_v25 = vpack.c.bf16 %v1033_v22, %v1033_v22  ;;  %v2567_v26 = vpop.f32.mrb[23].mxu1 }
 0x277   : > { %1400 = vrot.lane.b32.xlu1 %v3284_v25, %s2926_s22  ;;  %s495_s22 = scalar_select %p494_p6, %s3033_s17, 1 }
 0x279   : > { %s496_s24 = scalar_lea.vmem %s3584_s1, %s495_s22 }
 0x27a   : > { %v1046_v45 = vld [vmem:[%s496_s24] sm:$0x1] }
 0x27b   : > { %vm1047_vm3 = vcmp.gt.f32.partialorder %v1046_v45, 0.0 }
 0x27c   : > { %v1048_v49 = vsel %vm1047_vm3, 0.0, %v2927_v48 }
 0x27d   : > { %v1053_v50 = vrot.slane %v1048_v49, %v1052_v47 }
 0x2c1   : > { %v1057_v27 = vpop.permute.xlu1 %1056 }
 0x2c2   : > { %v1063_v28 = vsel %vm1058_vm2, %v1057_v27, 0 }
 0x2c3   : > { %2569 = vmatpush3.bf16.xpose.msra.mxu0 %v1063_v28 }
 0x2c4   : > { %2580 = vmatprep.subr.bf16.mxu0 %v2924_v9 }
 0x2c9   : > { %v1107_v29 = vpop.permute.xlu1 %1106 }
 0x2ca   : > { %v1112_v30 = vsel %vm1058_vm2, %v1107_v29, 0  ;;  %2571 = vmatmul.mubr.msk.bf16.vlgmr.msra.gmra.mrb[8].mxu0 %vm1058_vm2, %v3235_v42 }
 0x2cb   : > { %2575 = vmatpush3.bf16.xpose.msra.mxu1 %v1112_v30  ;;  %2582 = vmatprep.mubr.msk.bf16.mxu0 %vm2925_vm1, %v2924_v9 }
 0x2cc   : > { %2586 = vmatprep.subr.bf16.mxu1 %v2924_v9 }
 0x2d1   : > { %v1156_v31 = vpop.permute.xlu0 %1155 }
 0x2d2   : > { %v1161_v32 = vsel %vm1058_vm2, %v1156_v31, 0  ;;  %2577 = vmatmul.mubr.msk.bf16.vlgmr.msra.gmra.mrb[24].mxu1 %vm1058_vm2, %v3242_v53 }
 0x2d3   : > { %2581 = vmatpush3.bf16.xpose.msra.mxu0 %v1161_v32  ;;  %2588 = vmatprep.mubr.msk.bf16.mxu1 %vm2925_vm1, %v2924_v9 }
 0x2d4   : > { %2592 = vmatprep.subr.bf16.mxu0 %v2924_v9 }
 0x2d9   : > { %v1205_v33 = vpop.permute.xlu1 %1204 }
 0x2da   : > { %v1210_v34 = vsel %vm1058_vm2, %v1205_v33, 0  ;;  %2583 = vmatmul.mubr.msk.bf16.vlgmr.msra.gmra.mrb[12].mxu0 %vm1058_vm2, %v3249_v61 }
 0x2db   : > { %2587 = vmatpush3.bf16.xpose.msra.mxu1 %v1210_v34  ;;  %2594 = vmatprep.mubr.msk.bf16.mxu0 %vm2925_vm1, %v2924_v9 }
 0x2dc   : > { %2598 = vmatprep.subr.bf16.mxu1 %v2924_v9 }
 0x2dd   : > { %v1254_v35 = vpop.permute.xlu1 %1253 }
 0x2de   : > { %v1259_v36 = vsel %vm1058_vm2, %v1254_v35, 0 }
 0x2df   : > { %2593 = vmatpush3.bf16.xpose.msra.mxu0 %v1259_v36 }
 0x2e0   : > { %2604 = vmatprep.subr.bf16.mxu0 %v2924_v9 }
 0x2e1   : > { %v1303_v37 = vpop.permute.xlu1 %1302 }
 0x2e2   : > { %v1308_v38 = vsel %vm1058_vm2, %v1303_v37, 0  ;;  %2589 = vmatmul.mubr.msk.bf16.vlgmr.msra.gmra.mrb[28].mxu1 %vm1058_vm2, %v3259_v6 }
 0x2e3   : > { %2599 = vmatpush3.bf16.xpose.msra.mxu1 %v1308_v38  ;;  %2600 = vmatprep.mubr.msk.bf16.mxu1 %vm2925_vm1, %v2924_v9 }
 0x2e4   : > { %2610 = vmatprep.subr.bf16.mxu1 %v2924_v9 }
 0x2e5   : > { %v1352_v39 = vpop.permute.xlu1 %1351 }
 0x2e6   : > { %v1357_v40 = vsel %vm1058_vm2, %v1352_v39, 0  ;;  %2595 = vmatmul.mubr.msk.bf16.vlgmr.msra.gmra.mrb[16].mxu0 %vm1058_vm2, %v3266_v10 }
 0x2e7   : > { %2605 = vmatpush3.bf16.xpose.msra.mxu0 %v1357_v40  ;;  %2606 = vmatprep.mubr.msk.bf16.mxu0 %vm2925_vm1, %v2924_v9 }
 0x2e8   : > { %2616 = vmatprep.subr.bf16.mxu0 %v2924_v9 }
 0x2e9   : > { %v1401_v41 = vpop.permute.xlu1 %1400 }
 0x2ea   : > { %v1406_v43 = vsel %vm1058_vm2, %v1401_v41, 0  ;;  %2601 = vmatmul.mubr.msk.bf16.vlgmr.msra.gmra.mrb[32].mxu1 %vm1058_vm2, %v3273_v17 }
 0x2eb   : > { %2611 = vmatpush3.bf16.xpose.msra.mxu1 %v1406_v43  ;;  %2612 = vmatprep.mubr.msk.bf16.mxu1 %vm2925_vm1, %v2924_v9 }
 0x2ec   : > { %2622 = vmatprep.subr.bf16.mxu1 %v2924_v9 }
 0x2ee   : > { %2607 = vmatmul.mubr.msk.bf16.vlgmr.msra.gmra.mrb[20].mxu0 %vm1058_vm2, %v3280_v20 }
 0x2ef   : > { %2618 = vmatprep.mubr.msk.bf16.mxu0 %vm2925_vm1, %v2924_v9 }
 0x2f2   : > { %2613 = vmatmul.mubr.msk.bf16.vlgmr.msra.gmra.mrb[36].mxu1 %vm1058_vm2, %v3284_v25 }
 0x2f3   : > { %2624 = vmatprep.mubr.msk.bf16.mxu1 %vm2925_vm1, %v2924_v9 }
 0x39d   : > { %v1099_v51 = vpop.f32.mrb[8].mxu0 }
 0x39e   : > { %v3341_v52 = vadd.f32 %v1099_v51, %v1053_v50  ;;  %v2572_v54 = vpop.f32.mrb[9].mxu0 }
 0x39f   : > { %v1102_v55 = vpop.f32.mrb[10].mxu0 }
 0x3a0   : > { %v2573_v56 = vpop.f32.mrb[11].mxu0  ;;  %v1449_v57 = vsel %vm1448_vm4, %v3341_v52, -inf }
 0x3a1   : > { %1450 = vmax.xlane.f32.xlu1 %v1449_v57 }
 0x3a5   : > { %v1148_v58 = vpop.f32.mrb[24].mxu1 }
 0x3a6   : > { %v1149_v59 = vadd.f32 %v1148_v58, %v1053_v50  ;;  %v2578_v60 = vpop.f32.mrb[25].mxu1 }
 0x3a7   : > { %v1151_v62 = vpop.f32.mrb[26].mxu1 }
 0x3a8   : > { %v2579_v63 = vpop.f32.mrb[27].mxu1  ;;  %v1452_v0 = vsel %vm1448_vm4, %v1149_v59, -inf }
 0x3a9   : > { %1453 = vmax.xlane.f32.xlu0 %v1452_v0 }
 0x3ad   : > { %v1197_v1 = vpop.f32.mrb[12].mxu0 }
 0x3ae   : > { %v1198_v2 = vadd.f32 %v1197_v1, %v1053_v50  ;;  %v2584_v3 = vpop.f32.mrb[13].mxu0 }
 0x3af   : > { %v1200_v4 = vpop.f32.mrb[14].mxu0 }
 0x3b0   : > { %v2585_v5 = vpop.f32.mrb[15].mxu0  ;;  %v1455_v7 = vsel %vm1448_vm4, %v1198_v2, -inf }
 0x3b1   : > { %1456 = vmax.xlane.f32.xlu0 %v1455_v7 }
 0x3b5   : > { %v1246_v8 = vpop.f32.mrb[28].mxu1 }
 0x3b6   : > { %v1247_v11 = vadd.f32 %v1246_v8, %v1053_v50  ;;  %v2590_v12 = vpop.f32.mrb[29].mxu1 }
 0x3b7   : > { %v1249_v13 = vpop.f32.mrb[30].mxu1 }
 0x3b8   : > { %v2591_v14 = vpop.f32.mrb[31].mxu1  ;;  %v1458_v15 = vsel %vm1448_vm4, %v1247_v11, -inf }
 0x3b9   : > { %v1295_v16 = vpop.f32.mrb[16].mxu0  ;;  %1459 = vmax.xlane.f32.xlu1 %v1458_v15 }
 0x3ba   : > { %v3348_v18 = vadd.f32 %v1295_v16, %v1053_v50  ;;  %v2596_v19 = vpop.f32.mrb[17].mxu0 }
 0x3bb   : > { %v1298_v21 = vpop.f32.mrb[18].mxu0 }
 0x3bc   : > { %v2597_v22 = vpop.f32.mrb[19].mxu0  ;;  %v1461_v23 = vsel %vm1448_vm4, %v3348_v18, -inf }
 0x3bd   : > { %1462 = vmax.xlane.f32.xlu0 %v1461_v23  ;;  %v1344_v24 = vpop.f32.mrb[32].mxu1 }
 0x3be   : > { %v1345_v26 = vadd.f32 %v1344_v24, %v1053_v50  ;;  %v2602_v27 = vpop.f32.mrb[33].mxu1 }
 0x3bf   : > { %v1347_v28 = vpop.f32.mrb[34].mxu1 }
 0x3c0   : > { %v2603_v29 = vpop.f32.mrb[35].mxu1  ;;  %v1464_v30 = vsel %vm1448_vm4, %v1345_v26, -inf }
 0x3c1   : > { %v1393_v31 = vpop.f32.mrb[20].mxu0  ;;  %1465 = vmax.xlane.f32.xlu1 %v1464_v30 }
 0x3c2   : > { %v3353_v32 = vadd.f32 %v1393_v31, %v1053_v50  ;;  %v2608_v33 = vpop.f32.mrb[21].mxu0 }
 0x3c3   : > { %v1396_v34 = vpop.f32.mrb[22].mxu0 }
 0x3c4   : > { %v2609_v35 = vpop.f32.mrb[23].mxu0  ;;  %v1467_v36 = vsel %vm1448_vm4, %v3353_v32, -inf }
 0x3c5   : > { %1468 = vmax.xlane.f32.xlu0 %v1467_v36  ;;  %v1442_v37 = vpop.f32.mrb[36].mxu1 }
 0x3c6   : > { %v1443_v38 = vadd.f32 %v1442_v37, %v1053_v50  ;;  %v2614_v39 = vpop.f32.mrb[37].mxu1 }
 0x3c7   : > { %v1445_v40 = vpop.f32.mrb[38].mxu1 }
 0x3c8   : > { %v2615_v41 = vpop.f32.mrb[39].mxu1  ;;  %v1470_v43 = vsel %vm1448_vm4, %v1443_v38, -inf }
 0x3c9   : > { %1471 = vmax.xlane.f32.xlu1 %v1470_v43 }
 0x3da   : > { %1594 = vrot.lane.b32.xlu1 %v3242_v53, %s2928_s27 }
 0x3db   : > { %1545 = vrot.lane.b32.xlu0 %v3235_v42, %s2928_s27 }
 0x3de   : > { %1642 = vrot.lane.b32.xlu1 %v3249_v61, %s2928_s27 }
 0x3df   : > { %1690 = vrot.lane.b32.xlu0 %v3259_v6, %s2928_s27 }
 0x3e2   : > { %1738 = vrot.lane.b32.xlu1 %v3266_v10, %s2928_s27 }
 0x42e   : > { %v1451_v44 = vpop.xlane.xlu1 %1450 }
 0x42f   : > { %v1473_v45 = vsub.f32 %v3341_v52, %v1451_v44 }
 0x431   : > { %v1481_v46 = vmul.f32 1.442695, %v1473_v45 }
 0x433   : > { %2788 = vpow2.f32 %v1481_v46 }
 0x436   : > { %v1454_v47 = vpop.xlane.xlu0 %1453 }
 0x437   : > { %v1474_v48 = vsub.f32 %v1149_v59, %v1454_v47 }
 0x439   : > { %v1483_v53 = vmul.f32 1.442695, %v1474_v48 }
 0x43b   : > { %2790 = vpow2.f32 %v1483_v53 }
 0x43d   : > { %v3369_v49 = vpop.eup %2788 }
 0x43e   : > { %v1457_v42 = vpop.xlane.xlu0 %1456  ;;  %v1497_v61 = vsel %vm1448_vm4, %v3369_v49, 0.0 }
 0x43f   : > { %v1475_v50 = vsub.f32 %v1198_v2, %v1457_v42  ;;  %1498 = vadd.xlane.f32.xlu0 %v1497_v61 }
 0x441   : > { %v1485_v6 = vmul.f32 1.442695, %v1475_v50 }
 0x443   : > { %2792 = vpow2.f32 %v1485_v6 }
 0x445   : > { %v3373_v10 = vpop.eup %2790 }
 0x446   : > { %v1460_v51 = vpop.xlane.xlu1 %1459  ;;  %v1500_v52 = vsel %vm1448_vm4, %v3373_v10, 0.0 }
 0x447   : > { %v1476_v54 = vsub.f32 %v1247_v11, %v1460_v51  ;;  %1501 = vadd.xlane.f32.xlu1 %v1500_v52 }
 0x449   : > { %v1487_v55 = vmul.f32 1.442695, %v1476_v54 }
 0x44a   : > { %v1463_v57 = vpop.xlane.xlu0 %1462 }
 0x44b   : > { %2794 = vpow2.f32 %v1487_v55  ;;  %v1477_v16 = vsub.f32 %v3348_v18, %v1463_v57 }
 0x44d   : > { %v3377_v56 = vpop.eup %2792  ;;  %v1489_v19 = vmul.f32 1.442695, %v1477_v16 }
 0x44e   : > { %v1466_v58 = vpop.xlane.xlu1 %1465  ;;  %v1503_v59 = vsel %vm1448_vm4, %v3377_v56, 0.0 }
 0x44f   : > { %v1478_v60 = vsub.f32 %v1345_v26, %v1466_v58  ;;  %1504 = vadd.xlane.f32.xlu0 %v1503_v59 }
 0x451   : > { %v1491_v62 = vmul.f32 1.442695, %v1478_v60 }
 0x452   : > { %v1469_v63 = vpop.xlane.xlu0 %1468 }
 0x453   : > { %2796 = vpow2.f32 %v1491_v62  ;;  %v1479_v21 = vsub.f32 %v3353_v32, %v1469_v63 }
 0x455   : > { %v3381_v0 = vpop.eup %2794  ;;  %v1493_v22 = vmul.f32 1.442695, %v1479_v21 }
 0x456   : > { %v1546_v1 = vpop.permute.xlu0 %1545  ;;  %v1472_v2 = vpop.xlane.xlu1 %1471  ;;  %v1506_v3 = vsel %vm1448_vm4, %v3381_v0, 0.0 }
 0x457   : > { %v1552_v4 = vsel %vm1550_vm5, %v1546_v1, 0  ;;  %v1480_v5 = vsub.f32 %v1443_v38, %v1472_v2  ;;  %1507 = vadd.xlane.f32.xlu1 %v1506_v3 }
 0x458   : > { %2617 = vmatpush3.bf16.msra.mxu0 %v1552_v4 }
 0x459   : > { %v1495_v7 = vmul.f32 1.442695, %v1480_v5  ;;  %2628 = vmatprep.subr.bf16.mxu0 %v2924_v9 }
 0x45a   : > { %v1595_v8 = vpop.permute.xlu1 %1594  ;;  %v1691_v26 = vpop.permute.xlu0 %1690 }
 0x45b   : > { %2798 = vpow2.f32 %v1495_v7  ;;  %v1600_v11 = vsel %vm1550_vm5, %v1595_v8, 0  ;;  %v1696_v37 = vsel %vm1550_vm5, %v1691_v26, 0 }
 0x45c   : > { %2623 = vmatpush3.bf16.msra.mxu1 %v1600_v11  ;;  %2800 = vpow2.f32 %v1489_v19 }
 0x45d   : > { %v3388_v12 = vpop.eup %2796  ;;  %2634 = vmatprep.subr.bf16.mxu1 %v2924_v9  ;;  %2802 = vpow2.f32 %v1493_v22 }
 0x45e   : > { %v1512_v13 = vsel %vm1448_vm4, %v3388_v12, 0.0  ;;  %v1643_v27 = vpop.permute.xlu1 %1642 }
 0x45f   : > { %1513 = vadd.xlane.f32.xlu1 %v1512_v13  ;;  %v1648_v33 = vsel %vm1550_vm5, %v1643_v27, 0  ;;  %v2774_v27 = vld [vmem:[%s3589_s6] sm:$0xff]  }
 0x465   : > { %v3393_v14 = vpop.eup %2798  ;;  %1786 = vrot.lane.b32.xlu0 %v3273_v17, %s2928_s27 }
 0x466   : > { %v1518_v15 = vsel %vm1448_vm4, %v3393_v14, 0.0  ;;  %v3403_v23 = vpop.eup %2800 }
 0x467   : > { %1519 = vadd.xlane.f32.xlu1 %v1518_v15  ;;  %v1509_v17 = vsel %vm1448_vm4, %v3403_v23, 0.0  ;;  %v3407_v24 = vpop.eup %2802 }
 0x468   : > { %v1515_v18 = vsel %vm1448_vm4, %v3407_v24, 0.0 }
 0x478   : > { %1834 = vrot.lane.b32.xlu1 %v3280_v20, %s2928_s27  ;;  %v1739_v20 = vpop.permute.xlu1 %1738 }
 0x479   : > { %v1744_v43 = vsel %vm1550_vm5, %v1739_v20, 0 }
 0x484   : > { %1510 = vadd.xlane.f32.xlu0 %v1509_v17 }
 0x488   : > { %1516 = vadd.xlane.f32.xlu0 %v1515_v18 }
 0x49e   : > { %1882 = vrot.lane.b32.xlu0 %v3284_v25, %s2928_s27  ;;  %s2933_s27 = smov 28  }
 0x4cc   : > { %v1499_v28 = vpop.xlane.xlu0 %1498 }
 0x4cd   : > { %2804 = vrcp.f32 %v1499_v28  ;;  %v2775_v28 = vld [vmem:[%s3589_s6 + $0x8] sm:$0xff]  }
 0x4d4   : > { %v1502_v29 = vpop.xlane.xlu1 %1501 }
 0x4d5   : > { %2806 = vrcp.f32 %v1502_v29 }
 0x4d7   : > { %v2805_v30 = vpop.eup %2804 }
 0x4d8   : > { %v1529_v31 = vmul.f32 %v2805_v30, %v3369_v49 }
 0x4da   : > { %v1537_v32 = vpack.c.bf16 %v1529_v31, %v1529_v31 }
 0x4dc   : > { %2619 = vmatmul.mubr.msk.bf16.vlgmr.msra.gmra.mrb[24].mxu0 %vm1448_vm4, %v1537_v32  ;;  %v1505_v34 = vpop.xlane.xlu0 %1504 }
 0x4dd   : > { %2808 = vrcp.f32 %v1505_v34  ;;  %2629 = vmatpush3.bf16.msra.mxu0 %v1648_v33  ;;  %2630 = vmatprep.mubr.msk.bf16.mxu0 %vm2925_vm1, %v2924_v9 }
 0x4de   : > { %2640 = vmatprep.subr.bf16.mxu0 %v2924_v9 }
 0x4df   : > { %v2807_v25 = vpop.eup %2806 }
 0x4e0   : > { %v1530_v35 = vmul.f32 %v2807_v25, %v3373_v10  ;;  %v1787_v47 = vpop.permute.xlu0 %1786 }
 0x4e1   : > { %v1792_v53 = vsel %vm1550_vm5, %v1787_v47, 0 }
 0x4e2   : > { %v1538_v36 = vpack.c.bf16 %v1530_v35, %v1530_v35 }
 0x4e4   : > { %2625 = vmatmul.mubr.msk.bf16.vlgmr.msra.gmra.mrb[40].mxu1 %vm1448_vm4, %v1538_v36  ;;  %v1508_v38 = vpop.xlane.xlu1 %1507 }
 0x4e5   : > { %2635 = vmatpush3.bf16.msra.mxu1 %v1696_v37  ;;  %2810 = vrcp.f32 %v1508_v38  ;;  %2636 = vmatprep.mubr.msk.bf16.mxu1 %vm2925_vm1, %v2924_v9 }
 0x4e6   : > { %2646 = vmatprep.subr.bf16.mxu1 %v2924_v9 }
 0x4e7   : > { %v2809_v39 = vpop.eup %2808 }
 0x4e8   : > { %v1531_v40 = vmul.f32 %v2809_v39, %v3377_v56 }
 0x4ea   : > { %v1539_v41 = vpack.c.bf16 %v1531_v40, %v1531_v40 }
 0x4ec   : > { %2631 = vmatmul.mubr.msk.bf16.vlgmr.msra.gmra.mrb[28].mxu0 %vm1448_vm4, %v1539_v41  ;;  %v1514_v44 = vpop.xlane.xlu1 %1513 }
 0x4ed   : > { %2641 = vmatpush3.bf16.msra.mxu0 %v1744_v43  ;;  %2812 = vrcp.f32 %v1514_v44  ;;  %2642 = vmatprep.mubr.msk.bf16.mxu0 %vm2925_vm1, %v2924_v9 }
 0x4ee   : > { %2652 = vmatprep.subr.bf16.mxu0 %v2924_v9 }
 0x4ef   : > { %v2811_v45 = vpop.eup %2810 }
 0x4f0   : > { %v1532_v46 = vmul.f32 %v2811_v45, %v3381_v0 }
 0x4f2   : > { %v1540_v48 = vpack.c.bf16 %v1532_v46, %v1532_v46 }
 0x4f4   : > { %2637 = vmatmul.mubr.msk.bf16.vlgmr.msra.gmra.mrb[44].mxu1 %vm1448_vm4, %v1540_v48  ;;  %v1520_v50 = vpop.xlane.xlu1 %1519 }
 0x4f5   : > { %2647 = vmatpush3.bf16.msra.mxu1 %v1792_v53  ;;  %2648 = vmatprep.mubr.msk.bf16.mxu1 %vm2925_vm1, %v2924_v9  ;;  %2814 = vrcp.f32 %v1520_v50 }
 0x4f6   : > { %2658 = vmatprep.subr.bf16.mxu1 %v2924_v9 }
 0x4f7   : > { %v2813_v49 = vpop.eup %2812 }
 0x4f8   : > { %v1534_v42 = vmul.f32 %v2813_v49, %v3388_v12  ;;  %v1835_v59 = vpop.permute.xlu1 %1834 }
 0x4f9   : > { %v1840_v63 = vsel %vm1550_vm5, %v1835_v59, 0 }
 0x4fa   : > { %v1542_v61 = vpack.c.bf16 %v1534_v42, %v1534_v42 }
 0x4fc   : > { %2649 = vmatmul.mubr.msk.bf16.vlgmr.msra.gmra.mrb[48].mxu1 %vm1448_vm4, %v1542_v61 }
 0x4fd   : > { %2660 = vmatprep.mubr.msk.bf16.mxu1 %vm2925_vm1, %v2924_v9 }
 0x4ff   : > { %v2815_v10 = vpop.eup %2814 }
 0x500   : > { %v1536_v52 = vmul.f32 %v2815_v10, %v3393_v14 }
 0x502   : > { %v1544_v57 = vpack.c.bf16 %v1536_v52, %v1536_v52  ;;  %v2824_v52 = vld [vmem:[%s3123_s14] sm:$0xff] }
 0x511   : > { %v1511_v6 = vpop.xlane.xlu0 %1510 }
 0x512   : > { %2816 = vrcp.f32 %v1511_v6 }
 0x515   : > { %v1517_v51 = vpop.xlane.xlu0 %1516 }
 0x516   : > { %2818 = vrcp.f32 %v1517_v51  ;;  %v2413_v51 = vld [vmem:[%s3590_s7] ss:$0 sm:$0xff] }
 0x519   : > { %v1883_v54 = vpop.permute.xlu0 %1882 }
 0x51a   : > { %v1888_v55 = vsel %vm1550_vm5, %v1883_v54, 0 }
 0x51b   : > { %2659 = vmatpush3.bf16.msra.mxu1 %v1888_v55 }
 0x51c   : > { %v2817_v56 = vpop.eup %2816  ;;  %2672 = vmatprep.subr.bf16.mxu1 %v2924_v9 }
 0x51d   : > { %v1533_v58 = vmul.f32 %v2817_v56, %v3403_v23 }
 0x51e   : > { %2661 = vmatmul.mubr.msk.bf16.vlgmr.msra.gmra.mrb[52].mxu1 %vm1448_vm4, %v1544_v57 }
 0x51f   : > { %v1541_v60 = vpack.c.bf16 %v1533_v58, %v1533_v58  ;;  %2676 = vmatprep.mubr.msk.bf16.mxu1 %vm2925_vm1, %v2924_v9 }
 0x520   : > { %v2819_v62 = vpop.eup %2818 }
 0x521   : > { %2643 = vmatmul.mubr.msk.bf16.vlgmr.msra.gmra.mrb[32].mxu0 %vm1448_vm4, %v1541_v60  ;;  %v1535_v0 = vmul.f32 %v2819_v62, %v3407_v24 }
 0x522   : > { %2653 = vmatpush3.bf16.msra.mxu0 %v1840_v63  ;;  %2654 = vmatprep.mubr.msk.bf16.mxu0 %vm2925_vm1, %v2924_v9 }
 0x523   : > { %2664 = vmatprep.subr.bf16.mxu0 %v2924_v9  ;;  %v1543_v1 = vpack.c.bf16 %v1535_v0, %v1535_v0 }
 0x529   : > { %2655 = vmatmul.mubr.msk.bf16.vlgmr.msra.gmra.mrb[36].mxu0 %vm1448_vm4, %v1543_v1 }
 0x52a   : > { %2668 = vmatprep.mubr.msk.bf16.mxu0 %vm2925_vm1, %v2924_v9  ;;  %2665 = vmatpush3.bf16.msra.mxu0 %v2774_v27  ;;  %v2416_v27 = vld [vmem:[%s3594_s11] ss:$0 sm:$0xff] }
 0x52b   : > { %2666 = vmatprep.subr.bf16.mxu0 %v2924_v9 }
 0x52e   : > { %2667 = vmatpush3.bf16.msra.mxu0 %v2775_v28 }
 0x52f   : > { %2680 = vmatprep.subr.bf16.mxu0 %v2924_v9 }
 0x5af   : > { %v1588_v2 = vpop.f32.mrb[24].mxu0 }
 0x5b0   : > { %v2620_v3 = vpop.f32.mrb[25].mxu0 }
 0x5b1   : > { %v1591_v4 = vpop.f32.mrb[26].mxu0  ;;  %v2777_v3 = vld [vmem:[%s3593_s10 + $0x8] sm:$0xff]  }
 0x5b2   : > { %v2621_v5 = vpop.f32.mrb[27].mxu0  ;;  %v2778_v4 = vld [vmem:[%s3595_s12] sm:$0xff]  }
 0x5b7   : > { %v1636_v7 = vpop.f32.mrb[40].mxu1 }
 0x5b8   : > { %1931 = vrot.lane.b32.xlu1 %v1636_v7, %s2929_s23  ;;  %v2626_v8 = vpop.f32.mrb[41].mxu1  ;;  %s2934_s23 = smov 16  }
 0x5b9   : > { %v1639_v11 = vpop.f32.mrb[42].mxu1 }
 0x5ba   : > { %v2627_v12 = vpop.f32.mrb[43].mxu1 }
 0x5bb   : > { %v2414_v12 = vld [vmem:[%s3591_s8] ss:$0 sm:$0xff] }
 0x5bf   : > { %v1684_v13 = vpop.f32.mrb[28].mxu0 }
 0x5c0   : > { %1935 = vrot.lane.b32.xlu0 %v1684_v13, %s2930_s20  ;;  %v2632_v14 = vpop.f32.mrb[29].mxu0  ;;  %s2935_s20 = smov 24  }
 0x5c1   : > { %v1687_v15 = vpop.f32.mrb[30].mxu0  ;;  %v2415_v14 = vld [vmem:[%s3592_s9] ss:$0 sm:$0xff] }
 0x5c2   : > { %v2633_v16 = vpop.f32.mrb[31].mxu0 }
 0x5c7   : > { %v1732_v19 = vpop.f32.mrb[44].mxu1 }
 0x5c8   : > { %1939 = vrot.lane.b32.xlu1 %v1732_v19, %s2931_s15  ;;  %v2638_v21 = vpop.f32.mrb[45].mxu1  ;;  %s2430_s15 = sshll.u32 %s3033_s17, 7  ;;  %s2260_s17 = scalar_lea.sflag [#allocation4], %s3117_s28 }
 0x5c9   : > { %v1735_v22 = vpop.f32.mrb[46].mxu1  ;;  %v2779_v21 = vld [vmem:[%s3595_s12 + $0x8] sm:$0xff]   ;;  %s3538_s24 = scalar_lea.hbm %s3616_s19, %s2430_s15 }
 0x5ca   : > { %v2639_v23 = vpop.f32.mrb[47].mxu1  ;;  %v2780_v22 = vld [vmem:[%s3595_s12 + $0x10] sm:$0xff]  }
 0x5cb   : > { %v2781_v23 = vld [vmem:[%s3595_s12 + $0x18] sm:$0xff]  }
 0x5cf   : > { %v1828_v17 = vpop.f32.mrb[48].mxu1 }
 0x5d0   : > { %1947 = vrot.lane.b32.xlu1 %v1828_v17, %s2932_s18  ;;  %v2650_v24 = vpop.f32.mrb[49].mxu1  ;;  %v2782_v17 = vld [vmem:[%s3595_s12 + $0x20] sm:$0xff]   ;;  %s493_s18 = scalar_lea.vmem [#allocation5], %s2358_s21 }
 0x5d1   : > { %v1831_v18 = vpop.f32.mrb[50].mxu1  ;;  %v2783_v24 = vld [vmem:[%s3595_s12 + $0x28] sm:$0xff]   ;;  %s2273_s22 = sshll.u32 %s493_s18, 4  ;;  %s3540_s22 = int_to_ptr.vmem [resolvable:$true] %s2273_s22 }
 0x5d2   : > { %v2651_v26 = vpop.f32.mrb[51].mxu1  ;;  %v2784_v18 = vld [vmem:[%s3595_s12 + $0x30] sm:$0xff]   ;;  %s2855_s21 = scalar_lea.vmem %s3540_s22, 128 }
 0x5d3   : > { %v2785_v26 = vld [vmem:[%s3595_s12 + $0x38] sm:$0xff]   ;;  %p2856_p11 = scmp.ne.s32.totalorder %s3540_s22, %s2855_s21 }
 0x5d5   : > { %p2857_p13 = pnand %p2856_p11, %p3617_p12 }
 0x5d7   : > { %p2858_p7 = pneg %p2857_p13 }
 0x5f1   : > { %v1924_v20 = vpop.f32.mrb[52].mxu1 }
 0x5f2   : > { %1955 = vrot.lane.b32.xlu1 %v1924_v20, %s2933_s27  ;;  %v2662_v29 = vpop.f32.mrb[53].mxu1  ;;  %s2936_s27 = smov [#allocation5]  }
 0x5f3   : > { %v1927_v30 = vpop.f32.mrb[54].mxu1 }
 0x5f4   : > { %v1780_v31 = vpop.f32.mrb[32].mxu0  ;;  %v2663_v32 = vpop.f32.mrb[55].mxu1 }
 0x5f5   : > { %1943 = vrot.lane.b32.xlu0 %v1780_v31, %s2934_s23  ;;  %v2644_v33 = vpop.f32.mrb[33].mxu0  ;;  %s2859_s23 = sshll.u32 %s2936_s27, 4  ;;  %s2860_s23 = int_to_ptr.vmem [resolvable:$false] %s2859_s23 }
 0x5f6   : > { %v1783_v34 = vpop.f32.mrb[34].mxu0  ;;  %p2862_p10 = scmp.lt.s32.totalorder %s3540_s22, %s2860_s23 }
 0x5f7   : > { %v2645_v25 = vpop.f32.mrb[35].mxu0 }
 0x5fc   : > { %v1876_v35 = vpop.f32.mrb[36].mxu0 }
 0x5fd   : > { %1951 = vrot.lane.b32.xlu0 %v1876_v35, %s2935_s20  ;;  %v2656_v36 = vpop.f32.mrb[37].mxu0  ;;  %s2861_s20 = scalar_lea.vmem %s2860_s23, 256 }
 0x5fe   : > { %v1879_v37 = vpop.f32.mrb[38].mxu0  ;;  %p2863_p2 = scmp.lt.s32.totalorder %s2861_s20, %s2855_s21 }
 0x5ff   : > { %v2657_v38 = vpop.f32.mrb[39].mxu0 }
 0x600   : > { %p2864_p4 = por %p2863_p2, %p2862_p10 }
 0x602   : > { %p2865_p5 = pnand %p2864_p4, %p2858_p7 }
 0x62a   : > { %v1932_v39 = vpop.permute.xlu1 %1931 }
 0x62b   : > { %v1958_v43 = vsel %vm1058_vm2, %v1588_v2, %v1932_v39  ;;  %v2776_v2 = vld [vmem:[%s3593_s10] sm:$0xff]  }
 0x62c   : > { %2673 = vmatpush3.bf16.msra.mxu1 %v2776_v2 }
 0x62d   : > { %2674 = vmatprep.subr.bf16.mxu1 %v2924_v9 }
 0x630   : > { %2675 = vmatpush3.bf16.msra.mxu1 %v2777_v3 }
 0x632   : > { %v1936_v40 = vpop.permute.xlu0 %1935 }
 0x633   : > { %v1959_v45 = vsel %vm1448_vm4, %v1958_v43, %v1936_v40 }
 0x63a   : > { %v1940_v41 = vpop.permute.xlu1 %1939 }
 0x63b   : > { %v1961_v46 = vsel %vm1960_vm6, %v1959_v45, %v1940_v41  ;;  %v2428_v41 = vld [vmem:[%s3596_s13] ss:$0 sm:$0xff] }
 0x642   : > { %v1948_v47 = vpop.permute.xlu1 %1947 }
 0x664   : > { %v1956_v42 = vpop.permute.xlu1 %1955 }
 0x667   : > { %v1944_v44 = vpop.permute.xlu0 %1943 }
 0x668   : > { %v1963_v48 = vsel %vm1962_vm7, %v1961_v46, %v1944_v44 }
 0x669   : > { %v1965_v49 = vsel %vm1964_vm8, %v1963_v48, %v1948_v47 }
 0x66f   : > { %v1952_v53 = vpop.permute.xlu0 %1951 }
 0x670   : > { %v1967_v61 = vsel %vm1966_vm9, %v1965_v49, %v1952_v53 }
 0x671   : > { %v1969_v50 = vsel %vm1968_vm10, %v1967_v61, %v1956_v42 }
 0x672   : > { %v1970_v6 = vpack.c.bf16 %v1969_v50, %v1969_v50 }
 0x674   : > { %2669 = vmatmul.mubr.msk.bf16.vlgmr.msra.gmra.mrb[40].mxu0 %vm501_vm0, %v1970_v6 }
 0x675   : > { %2696 = vmatprep.mubr.msk.bf16.mxu0 %vm2925_vm1, %v2924_v9  ;;  %2681 = vmatpush3.bf16.msra.mxu0 %v2778_v4 }
 0x676   : > { %2682 = vmatprep.subr.bf16.mxu0 %v2924_v9 }
 0x679   : > { %2683 = vmatpush3.bf16.msra.mxu0 %v2779_v21 }
 0x67a   : > { %2684 = vmatprep.subr.bf16.mxu0 %v2924_v9 }
 0x67d   : > { %2685 = vmatpush3.bf16.msra.mxu0 %v2780_v22 }
 0x67e   : > { %2686 = vmatprep.subr.bf16.mxu0 %v2924_v9 }
 0x681   : > { %2687 = vmatpush3.bf16.msra.mxu0 %v2781_v23 }
 0x682   : > { %2688 = vmatprep.subr.bf16.mxu0 %v2924_v9 }
 0x685   : > { %2689 = vmatpush3.bf16.msra.mxu0 %v2782_v17 }
 0x686   : > { %2690 = vmatprep.subr.bf16.mxu0 %v2924_v9 }
 0x689   : > { %2691 = vmatpush3.bf16.msra.mxu0 %v2783_v24 }
 0x68a   : > { %2692 = vmatprep.subr.bf16.mxu0 %v2924_v9 }
 0x68d   : > { %2693 = vmatpush3.bf16.msra.mxu0 %v2784_v18 }
 0x68e   : > { %2694 = vmatprep.subr.bf16.mxu0 %v2924_v9 }
 0x691   : > { %2695 = vmatpush3.bf16.msra.mxu0 %v2785_v26 }
 0x747   : > { %v2024_v10 = vpop.f32.mrb[40].mxu0 }
 0x748   : > { %v2030_v54 = vadd.f32 %v2824_v52, %v2024_v10  ;;  %v2670_v55 = vpop.f32.mrb[41].mxu0 }
 0x749   : > { %v2027_v56 = vpop.f32.mrb[42].mxu0 }
 0x74a   : > { %v3474_v57 = vadd.f32 %v2413_v51, %v2030_v54  ;;  %v2671_v58 = vpop.f32.mrb[43].mxu0 }
 0x74c   : > { %v2041_v59 = vsel %vm501_vm0, %v3474_v57, 0.0 }
 0x74d   : > { %2042 = vadd.xlane.f32.xlu0 %v2041_v59 }
 0x7da   : > { %v2043_v60 = vpop.xlane.xlu0 %2042 }
 0x7db   : > { %v2044_v62 = vmul.f32 0.03125, %v2043_v60 }
 0x7dd   : > { %v2045_v63 = vsub.f32 %v3474_v57, %v2044_v62 }
 0x7df   : > { %v2046_v0 = vmul.f32 %v2045_v63, %v2045_v63 }
 0x7e1   : > { %v2047_v1 = vsel %vm501_vm0, %v2046_v0, 0.0 }
 0x7e2   : > { %2048 = vadd.xlane.f32.xlu1 %v2047_v1 }
 0x86f   : > { %v2049_v5 = vpop.xlane.xlu1 %2048 }
 0x870   : > { %v2050_v7 = vmul.f32 0.03125, %v2049_v5 }
 0x872   : > { %v2051_v8 = vadd.f32 1e-05, %v2050_v7 }
 0x874   : > { %2820 = vrsqrt.f32 %v2051_v8 }
 0x87e   : > { %v2821_v11 = vpop.eup %2820 }
 0x87f   : > { %v2053_v13 = vmul.f32 %v2821_v11, %v2045_v63 }
 0x881   : > { %v2060_v15 = vmul.f32 %v2414_v12, %v2053_v13 }
 0x883   : > { %v2067_v16 = vadd.f32 %v2415_v14, %v2060_v15 }
 0x885   : > { %v2068_v19 = vpack.c.bf16 %v2067_v16, %v2067_v16 }
 0x887   : > { %2677 = vmatmul.mubr.msk.bf16.vlgmr.msra.gmra.mrb[56].mxu1 %vm501_vm0, %v2068_v19 }
 0x95a   : > { %v2129_v28 = vpop.f32.mrb[56].mxu1 }
 0x95b   : > { %v2130_v20 = vadd.f32 %v2416_v27, %v2129_v28  ;;  %v2678_v29 = vpop.f32.mrb[57].mxu1 }
 0x95c   : > { %v2132_v30 = vpop.f32.mrb[58].mxu1 }
 0x95d   : > { %v2136_v31 = vmul.f32 0.044715, %v2130_v20  ;;  %v2679_v32 = vpop.f32.mrb[59].mxu1  ;;  %v2135_v9 = vmul.f32 0.5, %v2130_v20 }
 0x95f   : > { %v2137_v33 = vmul.f32 %v2136_v31, %v2130_v20 }
 0x961   : > { %v2138_v34 = vmul.f32 %v2137_v33, %v2130_v20 }
 0x963   : > { %v2139_v25 = vadd.f32 %v2138_v34, %v2130_v20 }
 0x965   : > { %v2140_v35 = vmul.f32 0.7978846, %v2139_v25 }
 0x967   : > { %2822 = vtanh.f32 %v2140_v35 }
 0x971   : > { %v2823_v36 = vpop.eup %2822 }
 0x972   : > { %v2142_v37 = vadd.f32 1.0, %v2823_v36 }
 0x974   : > { %v2143_v38 = vmul.f32 %v2142_v37, %v2135_v9 }
 0x976   : > { %v2144_v39 = vpack.c.bf16 %v2143_v38, %v2143_v38 }
 0x978   : > { %2697 = vmatmul.mubr.bf16.vlgmr.msra.gmra.mrb[44].mxu0 %v2144_v39 }
 0xa4b   : > { %v2243_v40 = vpop.f32.mrb[44].mxu0 }
 0xa4c   : > { %v2249_v43 = vadd.f32 %v2243_v40, %v3474_v57  ;;  %v2698_v44 = vpop.f32.mrb[45].mxu0 }
 0xa4d   : > { %v2246_v45 = vpop.f32.mrb[46].mxu0 }
 0xa4e   : > { %v2257_v46 = vadd.f32 %v2428_v41, %v2249_v43  ;;  %v2699_v47 = vpop.f32.mrb[47].mxu0 }
 0xa50   : > { %2258 = vst.msk [vmem:[%s493_s18] sm:$0xff] %vm501_vm0, %v2257_v46 }
 0xa51   : > { %2868 = shalt.err (!%p2865_p5)
}
 0xa52   : > { %s2869_s28 = scalar_lea.hbm %s3538_s24, 128  ;;  %s2873_s14 = scalar_lea.hbm %s3616_s19, 256 }
 0xa53   : > { %p2870_p8 = scmp.ne.s32.totalorder %s3538_s24, %s2869_s28  ;;  %p2874_p1 = scmp.lt.u32.totalorder %s3538_s24, %s3616_s19 }
 0xa54   : > { %p2875_p3 = scmp.lt.u32.totalorder %s2873_s14, %s2869_s28  ;;  %p2877_p11 = scmp.lt.u32.totalorder %s2869_s28, %s3538_s24 }
 0xa55   : > { %p2871_p9 = pnand %p2870_p8, %p3617_p12 }
 0xa56   : > { %p2876_p6 = por %p2875_p3, %p2874_p1 }
 0xa57   : > { %p2872_p0 = pneg %p2871_p9 }
 0xa58   : > { %p2878_p13 = por %p2877_p11, %p2876_p6 }
 0xa5a   : > { %p2879_p7 = pnand %p2878_p13, %p2872_p0 }
 0xa5c   : > { %2882 = shalt.err (!%p2879_p7)
}
 0xa5d   : > { %2702 = dma.vmem_to_hbm [thread:$0]  (%p3617_p12), %s3540_s22, 128, %s3538_s24, %s2260_s17  }
 0xa5e PF: > { %s3618_s21 = sld [smem:[#allocation8_spill]]  ;;  %p3619_p10 = scmp.ne.s32.totalorder %s3612_s26, 0 }
 0xa5f   : > { %p3620_p2 = scmp.ge.s32.totalorder %s2921_s16, 2 }
 0xa61   : > { %p2709_p4 = pnand %p3620_p2, %p3619_p10 }
 0xa64   : > { %s2285_s23 = sand.u32 1, %s3618_s21  }
 0xa65   : > { %s2286_s20 = scalar_lea.sflag [#allocation4], %s2285_s23 }
 0xa66   : > { %2904 = dma.done.wait (!%p2709_p4), %s2286_s20, 128  }
 0xa67   : > { %2906 = vsyncadd (!%p2709_p4), %s2286_s20, 4294967168  ;;  %s3621_s16 = sld [smem:[#allocation10_spill]]  ;;  %s3622_s28 = sld [smem:[#allocation9_spill]] }
 0xa68   : > { %s3623_s15 = sld [smem:[#allocation11_spill]]  ;;  %s3624_s29 = smov %s2913_s30 }
 0xa6d   : > { %p27_p5 = scmp.ge.s32.totalorder %s3621_s16, 4   ;;  %s3625_s30 = smov %s3622_s28 }
 0xa6f   :  { %29 = sbr.rel (!%p27_p5) target bundleno = 7 (0x7), region = 124 }
 0xa76   :  { %2291 = vsyncpa [#allocation3], 1 }
 0xa77   :  { %2293 = vsyncpa [#allocation3 + $0x1], 1 }
 0xa78   :  { %2294 = vsyncpa [#allocation4], 1 }
 0xa79   :  { %2296 = vsyncpa [#allocation4 + $0x1], 1 }

</bundles_post_ra>
